<compile_context>
chip_gen: v6e
topology: v6e:2x2x1
jax: 0.10.0
libtpu: 0.0.40
codegen_flags: <defaults>
</compile_context>

<pallas_src>
import functools

import numpy as np
import jax
import jax.numpy as jnp
from jax.experimental import pallas as pl
from jax.experimental.pallas import tpu as pltpu

BN_EPS = 1e-5


# ----------------------------------------------------------------------------
# Fused BasicBlock kernel: one grid step = Nb batch elements, full block.
# ----------------------------------------------------------------------------
def _fused_basicblock_kernel(x_ref, w1_ref, b1_ref, w2_ref, b2_ref, o_ref,
                             xp1_ref, xp2_ref, *, Nb, H, W, Cin, Cout):
    # x_ref  : (Nb, H, W*Cin)       f32   lane-dense input block
    # w1_ref : (3, W*Cin, W*Cout)   bf16  banded conv1 weights (BN1 folded)
    # b1_ref : (1, W*Cout)          f32   folded bias, tiled along W
    # w2_ref : (3, W*Cout, W*Cout)  bf16  banded conv2 weights (BN2 folded)
    # b2_ref : (1, W*Cout)          f32
    # o_ref  : (Nb, H, W*Cout)      f32   lane-dense output block
    # xp1_ref: (Nb, H+2, W*Cin)     bf16  row-padded conv1 input slab (VMEM)
    # xp2_ref: (Nb, H+2, W*Cout)    bf16  row-padded conv2 input slab (VMEM)
    M = Nb * H

    def conv3x3(xp_ref, w_ref, c_in):
        # Row-banded formulation: for each kernel row kh the whole conv row is
        # one dense (M, W*c_in) x (W*c_in, W*Cout) MXU matmul; the banded
        # weights already encode kw and the left/right zero padding.
        acc = None
        for kh in range(3):
            lhs = xp_ref[:, kh:kh + H, :].reshape(M, W * c_in)
            part = jnp.dot(lhs, w_ref[kh], preferred_element_type=jnp.float32)
            acc = part if acc is None else acc + part
        return acc                                          # (M, W*Cout) f32

    # --- stage conv1 input: zero ONLY the two halo rows, write the interior.
    xp1_ref[:, 0:1, :] = jnp.zeros((Nb, 1, W * Cin), jnp.bfloat16)
    xp1_ref[:, H + 1:H + 2, :] = jnp.zeros((Nb, 1, W * Cin), jnp.bfloat16)
    xp1_ref[:, 1:H + 1, :] = x_ref[...].astype(jnp.bfloat16)

    # --- conv1 + bn1 + relu (BN1 scale pre-folded into w1) ---
    h1 = jnp.maximum(conv3x3(xp1_ref, w1_ref, Cin) + b1_ref[...], 0.0)

    # --- stage conv2 input (stays on-chip, bf16) ---
    xp2_ref[:, 0:1, :] = jnp.zeros((Nb, 1, W * Cout), jnp.bfloat16)
    xp2_ref[:, H + 1:H + 2, :] = jnp.zeros((Nb, 1, W * Cout), jnp.bfloat16)
    xp2_ref[:, 1:H + 1, :] = h1.reshape(Nb, H, W * Cout).astype(jnp.bfloat16)

    # --- conv2 + bn2 + identity residual + relu ---
    res = x_ref[...].reshape(M, W * Cin)            # identity residual, f32
    out = jnp.maximum(conv3x3(xp2_ref, w2_ref, Cout) + b2_ref[...] + res, 0.0)
    o_ref[...] = out.reshape(Nb, H, W * Cout)


# ----------------------------------------------------------------------------
# Wrappers
# ----------------------------------------------------------------------------
def baseblock_sfl_forward_nhwc(x_nhwc, prepped, *, batch_block=4):
    """Fused Baseblock_SFL forward. x_nhwc: (N, H, W, C) float32 (NHWC)."""
    N, H, W, Cin = x_nhwc.shape
    w1, b1, w2, b2 = prepped["w1"], prepped["b1"], prepped["w2"], prepped["b2"]
    Cout = w1.shape[-1] // W
    assert w1.shape == (3, W * Cin, W * Cout)
    # TODO(synk): stride>1 and dim_change (downsampled residual) are not
    # implemented; this kernel covers the stride=1 identity-residual config.
    assert Cin == Cout
    Nb = min(batch_block, N)
    assert N % Nb == 0, "batch must be divisible by batch_block"

    # Lane-dense HBM views: W and C are adjacent in NHWC, so this reshape is a
    # free (contiguous) view, not a transpose.
    x_flat = x_nhwc.reshape(N, H, W * Cin)

    kernel = functools.partial(_fused_basicblock_kernel,
                               Nb=Nb, H=H, W=W, Cin=Cin, Cout=Cout)
    out_flat = pl.pallas_call(
        kernel,
        out_shape=jax.ShapeDtypeStruct((N, H, W * Cout), jnp.float32),
        grid=(N // Nb,),
        in_specs=[
            pl.BlockSpec((Nb, H, W * Cin), lambda n: (n, 0, 0)),
            pl.BlockSpec((3, W * Cin, W * Cout), lambda n: (0, 0, 0)),
            pl.BlockSpec((1, W * Cout), lambda n: (0, 0)),
            pl.BlockSpec((3, W * Cout, W * Cout), lambda n: (0, 0, 0)),
            pl.BlockSpec((1, W * Cout), lambda n: (0, 0)),
        ],
        out_specs=pl.BlockSpec((Nb, H, W * Cout), lambda n: (n, 0, 0)),
        scratch_shapes=[
            pltpu.VMEM((Nb, H + 2, W * Cin), jnp.bfloat16),
            pltpu.VMEM((Nb, H + 2, W * Cout), jnp.bfloat16),
        ],
        compiler_params=pltpu.CompilerParams(
            dimension_semantics=("parallel",)),   # v7x: batch split across TCs
    )(x_flat, w1, b1, w2, b2)
    return out_flat.reshape(N, H, W, Cout)


def baseblock_sfl_forward(x_nchw, prepped, *, batch_block=4):
    """NCHW drop-in wrapper (PyTorch layout). In a full ResNet keep
    activations NHWC end-to-end and transpose once at entry/exit instead."""
    x = jnp.transpose(x_nchw, (0, 2, 3, 1))
    y = baseblock_sfl_forward_nhwc(x, prepped, batch_block=batch_block)
    return jnp.transpose(y, (0, 3, 1, 2))


# ----------------------------------------------------------------------------
# Parameters: PyTorch-default-style conv init (kaiming_uniform a=sqrt(5),
# bias uniform(+-1/sqrt(fan_in))), BN in inference form.
# ----------------------------------------------------------------------------
def init_params(key, input_planes, planes):
    k1, k2, k3, k4 = jax.random.split(key, 4)

    def conv_init(kw, kb, cin, cout):
        fan_in = cin * 9
        wb = (1.0 / fan_in) ** 0.5
        w = jax.random.uniform(kw, (3, 3, cin, cout), jnp.float32, -wb, wb)
        bb = 1.0 / fan_in ** 0.5
        b = jax.random.uniform(kb, (cout,), jnp.float32, -bb, bb)
        return w, b                                   # HWIO layout

    def bn_init(c):
        return {"gamma": jnp.ones((c,), jnp.float32),
                "beta": jnp.zeros((c,), jnp.float32),
                "mean": jnp.zeros((c,), jnp.float32),
                "var": jnp.ones((c,), jnp.float32)}

    w1, cb1 = conv_init(k1, k2, input_planes, planes)
    w2, cb2 = conv_init(k3, k4, planes, planes)
    # TODO(synk): BatchNorm uses running statistics (inference mode);
    # training-mode batch statistics are not implemented.
    return {"conv1_w": w1, "conv1_b": cb1, "bn1": bn_init(planes),
            "conv2_w": w2, "conv2_b": cb2, "bn2": bn_init(planes)}


def _banded_conv_weights(w_hwio, W):
    """(3, 3, Cin, Cout) -> (3, W*Cin, W*Cout) block-banded matrices.

    big[kh, wi*Cin + ci, wo*Cout + co] = w[kh, kw, ci, co] with wi = wo + kw - 1,
    zero where wi falls outside [0, W).  This encodes the left/right 'same'
    padding, so the kernel only needs top/bottom zero rows in its slab.
    """
    w = np.asarray(jax.device_get(w_hwio), np.float32)
    _, _, cin, cout = w.shape
    big = np.zeros((3, W * cin, W * cout), np.float32)
    for kh in range(3):
        for kw in range(3):
            for wo in range(W):
                wi = wo + kw - 1
                if 0 <= wi < W:
                    big[kh, wi * cin:(wi + 1) * cin,
                        wo * cout:(wo + 1) * cout] = w[kh, kw]
    return jnp.asarray(big)


def prepare_block_params(params, W):
    """Fold BN scale into banded bf16 conv weights; fold+tile biases (f32)."""
    def fold(w_hwio, conv_b, bn):
        scale = bn["gamma"] / jnp.sqrt(bn["var"] + BN_EPS)         # (Cout,)
        bias = (conv_b - bn["mean"]) * scale + bn["beta"]          # (Cout,)
        return w_hwio * scale, bias                    # scale on output chans

    w1s, b1 = fold(params["conv1_w"], params["conv1_b"], params["bn1"])
    w2s, b2 = fold(params["conv2_w"], params["conv2_b"], params["bn2"])
    cout = b1.shape[0]
    return {
        "w1": _banded_conv_weights(w1s, W).astype(jnp.bfloat16),
        "b1": jnp.tile(b1, W).reshape(1, W * cout).astype(jnp.float32),
        "w2": _banded_conv_weights(w2s, W).astype(jnp.bfloat16),
        "b2": jnp.tile(b2, W).reshape(1, W * cout).astype(jnp.float32),
    }


# ----------------------------------------------------------------------------
# Pure-JAX f32 reference (inference-mode BN), for correctness checking.
# ----------------------------------------------------------------------------
def baseblock_ref_nhwc(x_nhwc, params):
    def bn(z, p):
        scale = p["gamma"] / jnp.sqrt(p["var"] + BN_EPS)
        return (z - p["mean"]) * scale + p["beta"]

    def conv(z, w, b):
        y = jax.lax.conv_general_dilated(
            z, w, window_strides=(1, 1), padding=((1, 1), (1, 1)),
            dimension_numbers=("NHWC", "HWIO", "NHWC"),
            precision=jax.lax.Precision.HIGHEST)
        return y + b

    h = jax.nn.relu(bn(conv(x_nhwc, params["conv1_w"], params["conv1_b"]),
                       params["bn1"]))
    h = bn(conv(h, params["conv2_w"], params["conv2_b"]), params["bn2"])
    return jax.nn.relu(h + x_nhwc)


if __name__ == "__main__":
    key = jax.random.PRNGKey(0)
    kx, kp = jax.random.split(key)

    # ResNet110 CIFAR-style block config: input_planes = planes = 16,
    # stride=1, dim_change=None. Small shapes for the demo.
    N, C, H, W = 8, 16, 16, 16
    x_nchw = jax.random.normal(kx, (N, C, H, W), jnp.float32)
    params = init_params(kp, input_planes=C, planes=C)
    prepped = prepare_block_params(params, W=W)

    # Transpose once at "network entry"; the blocks themselves are NHWC-native.
    x_nhwc = jnp.transpose(x_nchw, (0, 2, 3, 1))

    # Nb=4 -> grid=(2,): >=2 and even so v7x megacore can split the batch.
    fwd = jax.jit(functools.partial(baseblock_sfl_forward_nhwc, batch_block=4))
    out = fwd(x_nhwc, prepped)
    jax.block_until_ready(out)

    assert out.shape == (N, H, W, C), out.shape
    assert out.dtype == jnp.float32
    assert bool(jnp.all(out >= 0.0))              # post-ReLU

    # Correctness vs f32 reference (kernel feeds bf16 to the MXU -> loose tol).
    ref = baseblock_ref_nhwc(x_nhwc, params)
    err = float(jnp.max(jnp.abs(out - ref)))
    assert err < 0.15, f"max|out - ref| = {err}"
    print("KERNEL_OK")
</pallas_src>

<mosaic_0001>
module attributes {stable_mosaic.version = 11 : i64} {
  func.func @_fused_basicblock_kernel(%arg0: i32, %arg1: memref<4x16x256xf32, #tpu.memory_space<vmem>>, %arg2: memref<3x256x256xbf16, #tpu.memory_space<vmem>>, %arg3: memref<1x256xf32, #tpu.memory_space<vmem>>, %arg4: memref<3x256x256xbf16, #tpu.memory_space<vmem>>, %arg5: memref<1x256xf32, #tpu.memory_space<vmem>>, %arg6: memref<4x16x256xf32, #tpu.memory_space<vmem>>, %arg7: memref<4x18x256xbf16, #tpu.memory_space<vmem>>, %arg8: memref<4x18x256xbf16, #tpu.memory_space<vmem>>) attributes {dimension_semantics = [#tpu.dimension_semantics<parallel>], iteration_bounds = array<i64: 2>, scalar_prefetch = 0 : i64, scratch_operands = 2 : i64, tpu.core_type = #tpu.core_type<tc>, window_params = [{transform_indices = @transform_0, window_bounds = array<i64: 4, 16, 256>}, {pipeline_mode = #tpu.pipeline_mode<synchronous>, transform_indices = @transform_1, window_bounds = array<i64: 3, 256, 256>}, {pipeline_mode = #tpu.pipeline_mode<synchronous>, transform_indices = @transform_2, window_bounds = array<i64: 1, 256>}, {pipeline_mode = #tpu.pipeline_mode<synchronous>, transform_indices = @transform_3, window_bounds = array<i64: 3, 256, 256>}, {pipeline_mode = #tpu.pipeline_mode<synchronous>, transform_indices = @transform_4, window_bounds = array<i64: 1, 256>}, {transform_indices = @transform_5, window_bounds = array<i64: 4, 16, 256>}]} {
    %cst = arith.constant 0.000000e+00 : bf16
    %0 = vector.broadcast %cst : bf16 to vector<4x1x256xbf16>
    %c0 = arith.constant 0 : index
    %c0_0 = arith.constant 0 : index
    %c0_1 = arith.constant 0 : index
    %1 = vector.load %arg7[%c0, %c0_0, %c0_1] : memref<4x18x256xbf16, #tpu.memory_space<vmem>>, vector<4x1x256xbf16>
    tpu.vector_store %arg7[%c0, %c0_0, %c0_1], %0 {strides = array<i32>} : memref<4x18x256xbf16, #tpu.memory_space<vmem>>, vector<4x1x256xbf16>,
    %cst_2 = arith.constant 0.000000e+00 : bf16
    %2 = vector.broadcast %cst_2 : bf16 to vector<4x1x256xbf16>
    %c0_3 = arith.constant 0 : index
    %c17 = arith.constant 17 : index
    %c0_4 = arith.constant 0 : index
    %3 = vector.load %arg7[%c0_3, %c17, %c0_4] : memref<4x18x256xbf16, #tpu.memory_space<vmem>>, vector<4x1x256xbf16>
    tpu.vector_store %arg7[%c0_3, %c17, %c0_4], %2 {strides = array<i32>} : memref<4x18x256xbf16, #tpu.memory_space<vmem>>, vector<4x1x256xbf16>,
    %c0_5 = arith.constant 0 : index
    %c0_6 = arith.constant 0 : index
    %c0_7 = arith.constant 0 : index
    %4 = vector.load %arg1[%c0_5, %c0_6, %c0_7] : memref<4x16x256xf32, #tpu.memory_space<vmem>>, vector<4x16x256xf32>
    %5 = arith.truncf %4 : vector<4x16x256xf32> to vector<4x16x256xbf16>
    %c0_8 = arith.constant 0 : index
    %c1 = arith.constant 1 : index
    %c0_9 = arith.constant 0 : index
    %6 = vector.load %arg7[%c0_8, %c1, %c0_9] : memref<4x18x256xbf16, #tpu.memory_space<vmem>>, vector<4x16x256xbf16>
    tpu.vector_store %arg7[%c0_8, %c1, %c0_9], %5 {strides = array<i32>} : memref<4x18x256xbf16, #tpu.memory_space<vmem>>, vector<4x16x256xbf16>,
    %c0_10 = arith.constant 0 : index
    %c0_11 = arith.constant 0 : index
    %c0_12 = arith.constant 0 : index
    %7 = vector.load %arg7[%c0_10, %c0_11, %c0_12] : memref<4x18x256xbf16, #tpu.memory_space<vmem>>, vector<4x16x256xbf16>
    %8 = vector.shape_cast %7 : vector<4x16x256xbf16> to vector<64x256xbf16>
    %c0_13 = arith.constant 0 : index
    %c0_14 = arith.constant 0 : index
    %c0_15 = arith.constant 0 : index
    %9 = vector.load %arg2[%c0_13, %c0_14, %c0_15] : memref<3x256x256xbf16, #tpu.memory_space<vmem>>, vector<1x256x256xbf16>
    %10 = vector.shape_cast %9 : vector<1x256x256xbf16> to vector<256x256xbf16>
    %cst_16 = arith.constant dense<0.000000e+00> : vector<64x256xf32>
    %11 = tpu.matmul %8, %10, %cst_16 {dimension_numbers = #tpu.dot_dimension_numbers<[1], [0], [0], [1], [0, 0, 1, 1], [], []>} : vector<64x256xbf16>, vector<256x256xbf16>, vector<64x256xf32> -> vector<64x256xf32>
    %c0_17 = arith.constant 0 : index
    %c1_18 = arith.constant 1 : index
    %c0_19 = arith.constant 0 : index
    %12 = vector.load %arg7[%c0_17, %c1_18, %c0_19] : memref<4x18x256xbf16, #tpu.memory_space<vmem>>, vector<4x16x256xbf16>
    %13 = vector.shape_cast %12 : vector<4x16x256xbf16> to vector<64x256xbf16>
    %c1_20 = arith.constant 1 : index
    %c0_21 = arith.constant 0 : index
    %c0_22 = arith.constant 0 : index
    %14 = vector.load %arg2[%c1_20, %c0_21, %c0_22] : memref<3x256x256xbf16, #tpu.memory_space<vmem>>, vector<1x256x256xbf16>
    %15 = vector.shape_cast %14 : vector<1x256x256xbf16> to vector<256x256xbf16>
    %cst_23 = arith.constant dense<0.000000e+00> : vector<64x256xf32>
    %16 = tpu.matmul %13, %15, %cst_23 {dimension_numbers = #tpu.dot_dimension_numbers<[1], [0], [0], [1], [0, 0, 1, 1], [], []>} : vector<64x256xbf16>, vector<256x256xbf16>, vector<64x256xf32> -> vector<64x256xf32>
    %17 = arith.addf %11, %16 : vector<64x256xf32>
    %c0_24 = arith.constant 0 : index
    %c2 = arith.constant 2 : index
    %c0_25 = arith.constant 0 : index
    %18 = vector.load %arg7[%c0_24, %c2, %c0_25] : memref<4x18x256xbf16, #tpu.memory_space<vmem>>, vector<4x16x256xbf16>
    %19 = vector.shape_cast %18 : vector<4x16x256xbf16> to vector<64x256xbf16>
    %c2_26 = arith.constant 2 : index
    %c0_27 = arith.constant 0 : index
    %c0_28 = arith.constant 0 : index
    %20 = vector.load %arg2[%c2_26, %c0_27, %c0_28] : memref<3x256x256xbf16, #tpu.memory_space<vmem>>, vector<1x256x256xbf16>
    %21 = vector.shape_cast %20 : vector<1x256x256xbf16> to vector<256x256xbf16>
    %cst_29 = arith.constant dense<0.000000e+00> : vector<64x256xf32>
    %22 = tpu.matmul %19, %21, %cst_29 {dimension_numbers = #tpu.dot_dimension_numbers<[1], [0], [0], [1], [0, 0, 1, 1], [], []>} : vector<64x256xbf16>, vector<256x256xbf16>, vector<64x256xf32> -> vector<64x256xf32>
    %23 = arith.addf %17, %22 : vector<64x256xf32>
    %c0_30 = arith.constant 0 : index
    %c0_31 = arith.constant 0 : index
    %24 = vector.load %arg3[%c0_30, %c0_31] : memref<1x256xf32, #tpu.memory_space<vmem>>, vector<1x256xf32>
    %25 = vector.broadcast %24 : vector<1x256xf32> to vector<64x256xf32>
    %26 = arith.addf %23, %25 : vector<64x256xf32>
    %cst_32 = arith.constant 0.000000e+00 : f32
    %27 = vector.broadcast %cst_32 : f32 to vector<64x256xf32>
    %28 = arith.maximumf %26, %27 : vector<64x256xf32>
    %cst_33 = arith.constant 0.000000e+00 : bf16
    %29 = vector.broadcast %cst_33 : bf16 to vector<4x1x256xbf16>
    %c0_34 = arith.constant 0 : index
    %c0_35 = arith.constant 0 : index
    %c0_36 = arith.constant 0 : index
    %30 = vector.load %arg8[%c0_34, %c0_35, %c0_36] : memref<4x18x256xbf16, #tpu.memory_space<vmem>>, vector<4x1x256xbf16>
    tpu.vector_store %arg8[%c0_34, %c0_35, %c0_36], %29 {strides = array<i32>} : memref<4x18x256xbf16, #tpu.memory_space<vmem>>, vector<4x1x256xbf16>,
    %cst_37 = arith.constant 0.000000e+00 : bf16
    %31 = vector.broadcast %cst_37 : bf16 to vector<4x1x256xbf16>
    %c0_38 = arith.constant 0 : index
    %c17_39 = arith.constant 17 : index
    %c0_40 = arith.constant 0 : index
    %32 = vector.load %arg8[%c0_38, %c17_39, %c0_40] : memref<4x18x256xbf16, #tpu.memory_space<vmem>>, vector<4x1x256xbf16>
    tpu.vector_store %arg8[%c0_38, %c17_39, %c0_40], %31 {strides = array<i32>} : memref<4x18x256xbf16, #tpu.memory_space<vmem>>, vector<4x1x256xbf16>,
    %33 = vector.shape_cast %28 : vector<64x256xf32> to vector<4x16x256xf32>
    %34 = arith.truncf %33 : vector<4x16x256xf32> to vector<4x16x256xbf16>
    %c0_41 = arith.constant 0 : index
    %c1_42 = arith.constant 1 : index
    %c0_43 = arith.constant 0 : index
    %35 = vector.load %arg8[%c0_41, %c1_42, %c0_43] : memref<4x18x256xbf16, #tpu.memory_space<vmem>>, vector<4x16x256xbf16>
    tpu.vector_store %arg8[%c0_41, %c1_42, %c0_43], %34 {strides = array<i32>} : memref<4x18x256xbf16, #tpu.memory_space<vmem>>, vector<4x16x256xbf16>,
    %c0_44 = arith.constant 0 : index
    %c0_45 = arith.constant 0 : index
    %c0_46 = arith.constant 0 : index
    %36 = vector.load %arg1[%c0_44, %c0_45, %c0_46] : memref<4x16x256xf32, #tpu.memory_space<vmem>>, vector<4x16x256xf32>
    %37 = vector.shape_cast %36 : vector<4x16x256xf32> to vector<64x256xf32>
    %c0_47 = arith.constant 0 : index
    %c0_48 = arith.constant 0 : index
    %c0_49 = arith.constant 0 : index
    %38 = vector.load %arg8[%c0_47, %c0_48, %c0_49] : memref<4x18x256xbf16, #tpu.memory_space<vmem>>, vector<4x16x256xbf16>
    %39 = vector.shape_cast %38 : vector<4x16x256xbf16> to vector<64x256xbf16>
    %c0_50 = arith.constant 0 : index
    %c0_51 = arith.constant 0 : index
    %c0_52 = arith.constant 0 : index
    %40 = vector.load %arg4[%c0_50, %c0_51, %c0_52] : memref<3x256x256xbf16, #tpu.memory_space<vmem>>, vector<1x256x256xbf16>
    %41 = vector.shape_cast %40 : vector<1x256x256xbf16> to vector<256x256xbf16>
    %cst_53 = arith.constant dense<0.000000e+00> : vector<64x256xf32>
    %42 = tpu.matmul %39, %41, %cst_53 {dimension_numbers = #tpu.dot_dimension_numbers<[1], [0], [0], [1], [0, 0, 1, 1], [], []>} : vector<64x256xbf16>, vector<256x256xbf16>, vector<64x256xf32> -> vector<64x256xf32>
    %c0_54 = arith.constant 0 : index
    %c1_55 = arith.constant 1 : index
    %c0_56 = arith.constant 0 : index
    %43 = vector.load %arg8[%c0_54, %c1_55, %c0_56] : memref<4x18x256xbf16, #tpu.memory_space<vmem>>, vector<4x16x256xbf16>
    %44 = vector.shape_cast %43 : vector<4x16x256xbf16> to vector<64x256xbf16>
    %c1_57 = arith.constant 1 : index
    %c0_58 = arith.constant 0 : index
    %c0_59 = arith.constant 0 : index
    %45 = vector.load %arg4[%c1_57, %c0_58, %c0_59] : memref<3x256x256xbf16, #tpu.memory_space<vmem>>, vector<1x256x256xbf16>
    %46 = vector.shape_cast %45 : vector<1x256x256xbf16> to vector<256x256xbf16>
    %cst_60 = arith.constant dense<0.000000e+00> : vector<64x256xf32>
    %47 = tpu.matmul %44, %46, %cst_60 {dimension_numbers = #tpu.dot_dimension_numbers<[1], [0], [0], [1], [0, 0, 1, 1], [], []>} : vector<64x256xbf16>, vector<256x256xbf16>, vector<64x256xf32> -> vector<64x256xf32>
    %48 = arith.addf %42, %47 : vector<64x256xf32>
    %c0_61 = arith.constant 0 : index
    %c2_62 = arith.constant 2 : index
    %c0_63 = arith.constant 0 : index
    %49 = vector.load %arg8[%c0_61, %c2_62, %c0_63] : memref<4x18x256xbf16, #tpu.memory_space<vmem>>, vector<4x16x256xbf16>
    %50 = vector.shape_cast %49 : vector<4x16x256xbf16> to vector<64x256xbf16>
    %c2_64 = arith.constant 2 : index
    %c0_65 = arith.constant 0 : index
    %c0_66 = arith.constant 0 : index
    %51 = vector.load %arg4[%c2_64, %c0_65, %c0_66] : memref<3x256x256xbf16, #tpu.memory_space<vmem>>, vector<1x256x256xbf16>
    %52 = vector.shape_cast %51 : vector<1x256x256xbf16> to vector<256x256xbf16>
    %cst_67 = arith.constant dense<0.000000e+00> : vector<64x256xf32>
    %53 = tpu.matmul %50, %52, %cst_67 {dimension_numbers = #tpu.dot_dimension_numbers<[1], [0], [0], [1], [0, 0, 1, 1], [], []>} : vector<64x256xbf16>, vector<256x256xbf16>, vector<64x256xf32> -> vector<64x256xf32>
    %54 = arith.addf %48, %53 : vector<64x256xf32>
    %c0_68 = arith.constant 0 : index
    %c0_69 = arith.constant 0 : index
    %55 = vector.load %arg5[%c0_68, %c0_69] : memref<1x256xf32, #tpu.memory_space<vmem>>, vector<1x256xf32>
    %56 = vector.broadcast %55 : vector<1x256xf32> to vector<64x256xf32>
    %57 = arith.addf %54, %56 : vector<64x256xf32>
    %58 = arith.addf %57, %37 : vector<64x256xf32>
    %cst_70 = arith.constant 0.000000e+00 : f32
    %59 = vector.broadcast %cst_70 : f32 to vector<64x256xf32>
    %60 = arith.maximumf %58, %59 : vector<64x256xf32>
    %61 = vector.shape_cast %60 : vector<64x256xf32> to vector<4x16x256xf32>
    %c0_71 = arith.constant 0 : index
    %c0_72 = arith.constant 0 : index
    %c0_73 = arith.constant 0 : index
    %62 = vector.load %arg6[%c0_71, %c0_72, %c0_73] : memref<4x16x256xf32, #tpu.memory_space<vmem>>, vector<4x16x256xf32>
    tpu.vector_store %arg6[%c0_71, %c0_72, %c0_73], %61 {strides = array<i32>} : memref<4x16x256xf32, #tpu.memory_space<vmem>>, vector<4x16x256xf32>,
    return
  }
  func.func @transform_0(%arg0: i32) -> (i32, i32, i32) {
    %c0_i32 = arith.constant 0 : i32
    %c0_i32_0 = arith.constant 0 : i32
    %c0_i32_1 = arith.constant 0 : i32
    return %arg0, %c0_i32, %c0_i32_0 : i32, i32, i32
  }
  func.func @transform_1(%arg0: i32) -> (i32, i32, i32) {
    %c0_i32 = arith.constant 0 : i32
    %c0_i32_0 = arith.constant 0 : i32
    %c0_i32_1 = arith.constant 0 : i32
    %c0_i32_2 = arith.constant 0 : i32
    return %c0_i32, %c0_i32_0, %c0_i32_1 : i32, i32, i32
  }
  func.func @transform_2(%arg0: i32) -> (i32, i32) {
    %c0_i32 = arith.constant 0 : i32
    %c0_i32_0 = arith.constant 0 : i32
    %c0_i32_1 = arith.constant 0 : i32
    return %c0_i32, %c0_i32_0 : i32, i32
  }
  func.func @transform_3(%arg0: i32) -> (i32, i32, i32) {
    %c0_i32 = arith.constant 0 : i32
    %c0_i32_0 = arith.constant 0 : i32
    %c0_i32_1 = arith.constant 0 : i32
    %c0_i32_2 = arith.constant 0 : i32
    return %c0_i32, %c0_i32_0, %c0_i32_1 : i32, i32, i32
  }
  func.func @transform_4(%arg0: i32) -> (i32, i32) {
    %c0_i32 = arith.constant 0 : i32
    %c0_i32_0 = arith.constant 0 : i32
    %c0_i32_1 = arith.constant 0 : i32
    return %c0_i32, %c0_i32_0 : i32, i32
  }
  func.func @transform_5(%arg0: i32) -> (i32, i32, i32) {
    %c0_i32 = arith.constant 0 : i32
    %c0_i32_0 = arith.constant 0 : i32
    %c0_i32_1 = arith.constant 0 : i32
    return %arg0, %c0_i32, %c0_i32_0 : i32, i32, i32
  }
}

</mosaic_0001>

<bundles_post_ra>
// kernel: baseblock_sfl_forward_nhwc.1
= control target key start
LH: loop header
LB: loop body
LE: loop exit
PB: predicated region body
PF: predicated region fallthrough
CT: control target
= control target key end

     0   :  { %s3700_s18 = smov 0   ;;  %s4751_s0 = inlined_call_operand.vmem [shape: f32[8,16,256], index: 0, kind: input, shape index: {}]   ;;  %s4752_s1 = inlined_call_operand.vmem [shape: bf16[3,256,256], index: 1, kind: input, shape index: {}]   ;;  %s4753_s2 = inlined_call_operand.vmem [shape: f32[1,256], index: 2, kind: input, shape index: {}]   ;;  %s4754_s3 = inlined_call_operand.vmem [shape: bf16[3,256,256], index: 3, kind: input, shape index: {}]   ;;  %s4755_s4 = inlined_call_operand.vmem [shape: f32[1,256], index: 4, kind: input, shape index: {}]   ;;  %s4756_s5 = inlined_call_operand.vmem [shape: f32[8,16,256], index: 5, kind: output, shape index: {}]  }
   0x1 LB: > { %s2943_s19 = sadd.s32 4294967295, %s3668_s18   ;;  %p2947_p0 = scmp.ge.s32.totalorder %s3668_s18, 1  ;;  %s3668_s18 = sphi %s3700_s18, %s15_s18  }
   0x2   : > { %p189_p1 = scmp.lt.s32.totalorder %s3668_s18, 3 }
   0x4   : > { %p190_p2 = pnand %p2947_p0, %p189_p1 }
   0x5   : > { %s2948_s11 = sshll.u32 (!%p190_p2), %s2943_s19, 2 }
   0x6   : > { %193 = sbr.rel (%p190_p2) target bundleno = 675 (0x2a3), region = 40  ;;  %p220_p3 = scmp.lt.s32.totalorder (!%p190_p2), %s2948_s11, 7 }
   0xb   : > { %v3374_v0 = vld [vmem:[%s4752_s1 + $0x174] ss:$8 sps:$4 sm:$0xff]   ;;  %v3378_v2 = vld [vmem:[%s4752_s1 + $0x170] ss:$8 sps:$4 sm:$0xff]   ;;  %v3380_v4 = vld [vmem:[%s4752_s1 + $0x164] ss:$8 sps:$4 sm:$0xff]  }
   0xc   : > { %v3376_v1 = vld [vmem:[%s4752_s1 + $0x74] ss:$8 sps:$4 sm:$0xff]   ;;  %809 = vmatprep.subr.bf16.mxu0 %v3374_v0  ;;  %v3379_v3 = vld [vmem:[%s4752_s1 + $0x70] ss:$8 sps:$4 sm:$0xff]   ;;  %v3382_v5 = vld [vmem:[%s4752_s1 + $0x64] ss:$8 sps:$4 sm:$0xff]  }
   0xd   : > { %1082 = vmatprep.subr.bf16.mxu1 %v3376_v1  ;;  %810 = vmatpush1.bf16.msra.mxu0 %v3378_v2  ;;  %v3384_v6 = vld [vmem:[%s4752_s1 + $0x160] ss:$8 sps:$4 sm:$0xff]   ;;  %v3386_v8 = vld [vmem:[%s4752_s1 + $0x154] ss:$8 sps:$4 sm:$0xff]   ;;  %v3390_v10 = vld [vmem:[%s4752_s1 + $0x150] ss:$8 sps:$4 sm:$0xff]  }
   0xe   : > { %1083 = vmatpush1.bf16.msra.mxu1 %v3379_v3  ;;  %811 = vmatprep.subr.bf16.mxu0 %v3380_v4  ;;  %v3385_v7 = vld [vmem:[%s4752_s1 + $0x60] ss:$8 sps:$4 sm:$0xff]   ;;  %v3388_v9 = vld [vmem:[%s4752_s1 + $0x54] ss:$8 sps:$4 sm:$0xff]   ;;  %v3391_v11 = vld [vmem:[%s4752_s1 + $0x50] ss:$8 sps:$4 sm:$0xff]  }
   0xf   : > { %1084 = vmatprep.subr.bf16.mxu1 %v3382_v5  ;;  %v3392_v12 = vld [vmem:[%s4752_s1 + $0x144] ss:$8 sps:$4 sm:$0xff]   ;;  %v3396_v14 = vld [vmem:[%s4752_s1 + $0x140] ss:$8 sps:$4 sm:$0xff]   ;;  %v3398_v16 = vld [vmem:[%s4752_s1 + $0x134] ss:$8 sps:$4 sm:$0xff]  }
  0x10   : > { %v3394_v13 = vld [vmem:[%s4752_s1 + $0x44] ss:$8 sps:$4 sm:$0xff]   ;;  %v3397_v15 = vld [vmem:[%s4752_s1 + $0x40] ss:$8 sps:$4 sm:$0xff]   ;;  %v3400_v17 = vld [vmem:[%s4752_s1 + $0x34] ss:$8 sps:$4 sm:$0xff]  }
  0x11   : > { %812 = vmatpush1.bf16.msra.mxu0 %v3384_v6  ;;  %v3402_v18 = vld [vmem:[%s4752_s1 + $0x130] ss:$8 sps:$4 sm:$0xff]   ;;  %v3404_v20 = vld [vmem:[%s4752_s1 + $0x124] ss:$8 sps:$4 sm:$0xff]   ;;  %v3408_v22 = vld [vmem:[%s4752_s1 + $0x120] ss:$8 sps:$4 sm:$0xff]  }
  0x12   : > { %1085 = vmatpush1.bf16.msra.mxu1 %v3385_v7  ;;  %813 = vmatprep.subr.bf16.mxu0 %v3386_v8  ;;  %v3403_v19 = vld [vmem:[%s4752_s1 + $0x30] ss:$8 sps:$4 sm:$0xff]   ;;  %v3406_v21 = vld [vmem:[%s4752_s1 + $0x24] ss:$8 sps:$4 sm:$0xff]   ;;  %v3409_v23 = vld [vmem:[%s4752_s1 + $0x20] ss:$8 sps:$4 sm:$0xff]  }
  0x13   : > { %1086 = vmatprep.subr.bf16.mxu1 %v3388_v9  ;;  %v3410_v24 = vld [vmem:[%s4752_s1 + $0x114] ss:$8 sps:$4 sm:$0xff]   ;;  %v3414_v26 = vld [vmem:[%s4752_s1 + $0x110] ss:$8 sps:$4 sm:$0xff]   ;;  %v3416_v28 = vld [vmem:[%s4752_s1 + $0x104] ss:$8 sps:$4 sm:$0xff]  }
  0x14   : > { %v3412_v25 = vld [vmem:[%s4752_s1 + $0x14] ss:$8 sps:$4 sm:$0xff]   ;;  %v3415_v27 = vld [vmem:[%s4752_s1 + $0x10] ss:$8 sps:$4 sm:$0xff]   ;;  %v3418_v29 = vld [vmem:[%s4752_s1 + $0x4] ss:$8 sps:$4 sm:$0xff]  }
  0x15   : > { %814 = vmatpush1.bf16.msra.mxu0 %v3390_v10  ;;  %v3420_v30 = vld [vmem:[%s4752_s1 + $0x100] ss:$8 sps:$4 sm:$0xff]   ;;  %v3422_v32 = vld [vmem:[%s4752_s1 + $0x1f4] ss:$8 sps:$4 sm:$0xff]   ;;  %v3426_v34 = vld [vmem:[%s4752_s1 + $0x1f0] ss:$8 sps:$4 sm:$0xff]  }
  0x16   : > { %1087 = vmatpush1.bf16.msra.mxu1 %v3391_v11  ;;  %815 = vmatprep.subr.bf16.mxu0 %v3392_v12  ;;  %v3421_v31 = vld [vmem:[%s4752_s1] ss:$8 sps:$4 sm:$0xff]   ;;  %v3424_v33 = vld [vmem:[%s4752_s1 + $0xf4] ss:$8 sps:$4 sm:$0xff]   ;;  %v3427_v35 = vld [vmem:[%s4752_s1 + $0xf0] ss:$8 sps:$4 sm:$0xff]  }
  0x17   : > { %1088 = vmatprep.subr.bf16.mxu1 %v3394_v13  ;;  %v3428_v36 = vld [vmem:[%s4752_s1 + $0x1e4] ss:$8 sps:$4 sm:$0xff]   ;;  %s4770_s11 = smov (!%p220_p3, %s2948_s11), 7  ;;  %v3432_v38 = vld [vmem:[%s4752_s1 + $0x1e0] ss:$8 sps:$4 sm:$0xff]   ;;  %vm234_vm2 = vcmask 1040384  }
  0x18   : > { %v3430_v37 = vld [vmem:[%s4752_s1 + $0xe4] ss:$8 sps:$4 sm:$0xff]   ;;  %v3433_v39 = vld [vmem:[%s4752_s1 + $0xe0] ss:$8 sps:$4 sm:$0xff]   ;;  %v3434_v40 = vld [vmem:[%s4752_s1 + $0x1d4] ss:$8 sps:$4 sm:$0xff]  }
  0x19   : > { %816 = vmatpush1.bf16.msra.mxu0 %v3396_v14  ;;  %v3436_v41 = vld [vmem:[%s4752_s1 + $0xd4] ss:$8 sps:$4 sm:$0xff]   ;;  %s3348_s10 = sshll.u32 %s4770_s11, 5  ;;  %v3438_v42 = vld [vmem:[%s4752_s1 + $0x1d0] ss:$8 sps:$4 sm:$0xff]   ;;  %vm237_vm3 = vcmask 1044484  }
  0x1a   : > { %1089 = vmatpush1.bf16.msra.mxu1 %v3397_v15  ;;  %817 = vmatprep.subr.bf16.mxu0 %v3398_v16  ;;  %v3439_v43 = vld [vmem:[%s4752_s1 + $0xd0] ss:$8 sps:$4 sm:$0xff]   ;;  %vm235_vm0 = vsmask.f32 256  ;;  %v3440_v44 = vld [vmem:[%s4752_s1 + $0x1c4] ss:$8 sps:$4 sm:$0xff]   ;;  %s3862_s27 = scalar_lea.vmem %s4751_s0, %s3348_s10  ;;  %s4693_s28 = scalar_lea.vmem %s4756_s5, %s3348_s10 }
  0x1b   : > { %1090 = vmatprep.subr.bf16.mxu1 %v3400_v17  ;;  %vm238_vm1 = vsmask.f32 4352  ;;  %v3442_v45 = vld [vmem:[%s4752_s1 + $0xc4] ss:$8 sps:$4 sm:$0xff]   ;;  %v3444_v46 = vld [vmem:[%s4752_s1 + $0x1c0] ss:$8 sps:$4 sm:$0xff]   ;;  %vm236_vm4 = vmand %vm234_vm2, %vm235_vm0 }
  0x1c   : > { %v3445_v47 = vld [vmem:[%s4752_s1 + $0xc0] ss:$8 sps:$4 sm:$0xff]   ;;  %vm253_vm5 = vsmask.f32 7938  ;;  %v3446_v48 = vld [vmem:[%s4752_s1 + $0x1b4] ss:$8 sps:$4 sm:$0xff]   ;;  %vm239_vm6 = vmand %vm237_vm3, %vm238_vm1 }
  0x1d   : > { %818 = vmatpush1.bf16.msra.mxu0 %v3402_v18  ;;  %v3448_v49 = vld [vmem:[%s4752_s1 + $0xb4] ss:$8 sps:$4 sm:$0xff]   ;;  %v241_v50 = vld [vmem:[#allocation2 + $0x40] sm:$0x11]  ;;  %vm255_vm7 = vsmask.f32 7954  ;;  %vm3873_vm8 = vmor %vm239_vm6, %vm236_vm4 }
  0x1e   : > { %1091 = vmatpush1.bf16.msra.mxu1 %v3403_v19  ;;  %819 = vmatprep.subr.bf16.mxu0 %v3404_v20  ;;  %v258_v51 = vld [vmem:[#allocation2 + $0x38] sm:$0x11]  ;;  %v270_v53 = vld [vmem:[%s3862_s27] sm:$0xff]  ;;  %v271_v54 = vld [vmem:[%s3862_s27 + $0x8] sm:$0xff]  ;;  %v242_v55 = vsel %vm3873_vm8, 0, %v241_v50  ;;  %vm408_vm12 = vcmask 1043456  }
  0x1f   : > { %1092 = vmatprep.subr.bf16.mxu1 %v3406_v21  ;;  %vm254_vm9 = vmand %vm234_vm2, %vm253_vm5  ;;  %v272_v56 = vld [vmem:[%s3862_s27 + $0x10] sm:$0xff]  ;;  %v273_v57 = vld [vmem:[%s3862_s27 + $0x18] sm:$0xff]  ;;  %v3350_v58 = vpack.c.bf16 %v271_v54, %v270_v53  ;;  %vm326_vm10 = vsmask.f32 4368  ;;  %243 = vst [vmem:[#allocation2 + $0x40] sm:$0x11] %v242_v55 }
  0x20   : > { %vm256_vm11 = vmand %vm237_vm3, %vm255_vm7  ;;  %v3351_v59 = vpack.c.bf16 %v273_v57, %v272_v56  ;;  %vm410_vm13 = vcmask 1047556   ;;  %v3450_v60 = vld [vmem:[%s4752_s1 + $0x1b0] ss:$8 sps:$4 sm:$0xff]   ;;  %v3452_v5 = vld [vmem:[%s4752_s1 + $0x1a4] ss:$8 sps:$4 sm:$0xff]   ;;  %vm1167_vm6 = vcmask 1042432  }
  0x21   : > { %820 = vmatpush1.bf16.msra.mxu0 %v3408_v22  ;;  %v3451_v61 = vld [vmem:[%s4752_s1 + $0xb0] ss:$8 sps:$4 sm:$0xff]   ;;  %vm3893_vm14 = vmor %vm256_vm11, %vm254_vm9  ;;  %v329_v63 = vshrl.u32 %v3350_v58, 16  ;;  %v332_v0 = vshll.u32 %v3350_v58, 16  ;;  %v3454_v6 = vld [vmem:[%s4752_s1 + $0xa4] ss:$8 sps:$4 sm:$0xff]  }
  0x22   : > { %1093 = vmatpush1.bf16.msra.mxu1 %v3409_v23  ;;  %821 = vmatprep.subr.bf16.mxu0 %v3410_v24  ;;  %v259_v1 = vsel %vm3893_vm14, 0, %v258_v51  ;;  %vm3900_vm15 = vmor %vm235_vm0, %vm326_vm10  ;;  %v337_v3 = vshrl.u32 %v3351_v59, 16  ;;  %v340_v4 = vshll.u32 %v3351_v59, 16  ;;  %v3456_v9 = vld [vmem:[%s4752_s1 + $0x1a0] ss:$8 sps:$4 sm:$0xff]  }
  0x23   : > { %1094 = vmatprep.subr.bf16.mxu1 %v3412_v25  ;;  %260 = vst [vmem:[#allocation2 + $0x38] sm:$0x11] %v259_v1  ;;  %v331_v7 = vrot.slane %v329_v63, 7  ;;  %vm409_vm0 = vmand %vm408_vm12, %vm253_vm5  ;;  %v3457_v13 = vld [vmem:[%s4752_s1 + $0xa0] ss:$8 sps:$4 sm:$0xff]  }
  0x24   : > { %v339_v8 = vrot.slane %v337_v3, 7  ;;  %vm411_vm1 = vmand %vm410_vm13, %vm255_vm7  ;;  %v3458_v15 = vld [vmem:[%s4752_s1 + $0x194] ss:$8 sps:$4 sm:$0xff]   ;;  %v3462_v19 = vld [vmem:[%s4752_s1 + $0x190] ss:$8 sps:$4 sm:$0xff]   ;;  %vm1168_vm7 = vcmask 1046532  }
  0x25   : > { %822 = vmatpush1.bf16.msra.mxu0 %v3414_v26  ;;  %v334_v10 = vor.u32 %v332_v0, %v331_v7  ;;  %v335_v11 = vrot.slane %v331_v7, 4  ;;  %vm3917_vm2 = vmor %vm411_vm1, %vm409_vm0  ;;  %v3460_v16 = vld [vmem:[%s4752_s1 + $0x94] ss:$8 sps:$4 sm:$0xff]   ;;  %v3463_v20 = vld [vmem:[%s4752_s1 + $0x90] ss:$8 sps:$4 sm:$0xff]  }
  0x26   : > { %1095 = vmatpush1.bf16.msra.mxu1 %v3415_v27  ;;  %823 = vmatprep.subr.bf16.mxu0 %v3416_v28  ;;  %v342_v14 = vor.u32 %v340_v4, %v339_v8  ;;  %v344_v17 = vrot.slane %v339_v8, 4  ;;  %v413_v18 = vld [vmem:[#allocation2 + $0x40] sm:$0xff]  ;;  %vm485_vm3 = vsmask.f32 3328  ;;  %vm486_vm4 = vsmask.f32 7440  ;;  %vm4083_vm9 = vmor %vm1167_vm6, %vm1168_vm7 }
  0x27   : > { %1096 = vmatprep.subr.bf16.mxu1 %v3418_v29  ;;  %v414_v22 = vsel %vm3917_vm2, %v334_v10, %v413_v18  ;;  %v3464_v23 = vld [vmem:[%s4752_s1 + $0x184] ss:$8 sps:$4 sm:$0xff]   ;;  %vm3975_vm5 = vmor %vm485_vm3, %vm486_vm4  ;;  %v247_v4 = vld [vmem:[#allocation2 + $0x50] sm:$0x11] }
  0x28   : > { %v3938_v21 = vsel %vm3900_vm15, %v335_v11, %v342_v14  ;;  %415 = vst [vmem:[#allocation2 + $0x40] sm:$0xff] %v414_v22  ;;  %v489_v24 = vshrl.u32 %v414_v22, 16  ;;  %v492_v25 = vshll.u32 %v414_v22, 16  ;;  %v278_v63 = vld [vmem:[%s3862_s27 + $0x40] sm:$0xff]  ;;  %v248_v7 = vsel %vm3873_vm8, 0, %v247_v4  ;;  %v280_v10 = vld [vmem:[%s3862_s27 + $0x50] sm:$0xff] }
  0x29   : > { %824 = vmatpush1.bf16.msra.mxu0 %v3420_v30  ;;  %v498_v26 = vshll.u32 %v3938_v21, 16  ;;  %v502_v27 = vshrl.u32 %v3938_v21, 16  ;;  %v3035_v29 = vcombine.high %v414_v22, %v3938_v21  ;;  %v3466_v30 = vld [vmem:[%s4752_s1 + $0x84] ss:$8 sps:$4 sm:$0xff]   ;;  %v281_v11 = vld [vmem:[%s3862_s27 + $0x58] sm:$0xff] }
  0x2a   : > { %1097 = vmatpush1.bf16.msra.mxu1 %v3421_v31  ;;  %825 = vmatprep.subr.bf16.mxu0 %v3422_v32  ;;  %v417_v28 = vld [vmem:[#allocation2 + $0x38] sm:$0x11]  ;;  %v491_v32 = vrot.slane %v489_v24, 4  ;;  %249 = vst [vmem:[#allocation2 + $0x50] sm:$0x11] %v248_v7 }
  0x2b   : > { %1098 = vmatprep.subr.bf16.mxu1 %v3424_v33  ;;  %v418_v31 = vsel %vm3873_vm8, %v344_v17, %v417_v28  ;;  %v494_v33 = vrot.slane %v492_v25, 5  ;;  %1114 = vmatprep.mubr.bf16.mxu1 %v3035_v29  ;;  %v3475_v25 = vld [vmem:[%s4752_s1 + $0x264] ss:$8 sps:$4 sm:$0xff]   ;;  %v3617_v52 = vld [vmem:[%s4754_s3 + $0x260] ss:$8 sps:$4 sm:$0xff]  }
  0x2c   : > { %419 = vst [vmem:[#allocation2 + $0x38] sm:$0x11] %v418_v31 }
  0x2d   : > { %826 = vmatpush2.bf16.msra.mxu0 %v3426_v34  ;;  %v500_v34 = vrot.slane %v498_v26, 5 }
  0x2e   : > { %1099 = vmatpush2.bf16.msra.mxu1 %v3427_v35  ;;  %827 = vmatprep.subr.bf16.mxu0 %v3428_v36  ;;  %v504_v35 = vrot.slane %v502_v27, 4  ;;  %v3468_v36 = vld [vmem:[%s4752_s1 + $0x180] ss:$8 sps:$4 sm:$0xff]   ;;  %v3355_v27 = vpack.c.bf16 %v281_v11, %v280_v10 }
  0x2f   : > { %1100 = vmatprep.subr.bf16.mxu1 %v3430_v37  ;;  %v3469_v37 = vld [vmem:[%s4752_s1 + $0x80] ss:$8 sps:$4 sm:$0xff]  }
  0x31   : > { %828 = vmatpush2.bf16.msra.mxu0 %v3432_v38  ;;  %v495_v38 = vor.u32 %v494_v33, %v491_v32 }
  0x32   : > { %1101 = vmatpush2.bf16.msra.mxu1 %v3433_v39  ;;  %829 = vmatprep.subr.bf16.mxu0 %v3434_v40  ;;  %v3472_v39 = vld [vmem:[%s4752_s1 + $0x274] ss:$8 sps:$4 sm:$0xff]   ;;  %v505_v40 = vor.u32 %v504_v35, %v500_v34  ;;  %v250_v35 = vld [vmem:[#allocation2 + $0x48] sm:$0x11] }
  0x33   : > { %1102 = vmatprep.subr.bf16.mxu1 %v3436_v41  ;;  %v244_v41 = vld [vmem:[#allocation2] sm:$0x11]  ;;  %v496_v50 = vrot.slane %v495_v38, 4  ;;  %v3971_v54 = vld [vmem:[#allocation2 + $0x38] sm:$0x11] }
  0x34   : > { %v506_v56 = vrot.slane %v505_v40, 4  ;;  %v508_v57 = vshll.u32 %v3971_v54, 16 }
  0x35   : > { %830 = vmatpush2.bf16.msra.mxu0 %v3438_v42  ;;  %v261_v42 = vld [vmem:[#allocation2 + $0x10] sm:$0x11]  ;;  %v501_v0 = vsel %vm3975_vm5, %v496_v50, %v500_v34 }
  0x36   : > { %1103 = vmatpush2.bf16.msra.mxu1 %v3439_v43  ;;  %831 = vmatprep.subr.bf16.mxu0 %v3440_v44  ;;  %v274_v43 = vld [vmem:[%s3862_s27 + $0x20] sm:$0xff]  ;;  %v3034_v44 = vcombine.low %v414_v22, %v3938_v21  ;;  %v510_v1 = vrot.slane %v508_v57, 5 }
  0x37   : > { %1104 = vmatprep.subr.bf16.mxu1 %v3442_v45  ;;  %v245_v45 = vsel %vm3873_vm8, 0, %v244_v41  ;;  %v267_v41 = vld [vmem:[#allocation2 + $0x58] sm:$0x11] }
  0x38   : > { %246 = vst [vmem:[#allocation2] sm:$0x11] %v245_v45 }
  0x39   : > { %832 = vmatpush2.bf16.msra.mxu0 %v3444_v46  ;;  %v262_v46 = vsel %vm3893_vm14, 0, %v261_v42  ;;  %v282_v42 = vld [vmem:[%s3862_s27 + $0x60] sm:$0xff] }
  0x3a   : > { %1105 = vmatpush2.bf16.msra.mxu1 %v3445_v47  ;;  %833 = vmatprep.subr.bf16.mxu0 %v3446_v48  ;;  %v275_v47 = vld [vmem:[%s3862_s27 + $0x28] sm:$0xff]  ;;  %v276_v48 = vld [vmem:[%s3862_s27 + $0x30] sm:$0xff]  ;;  %263 = vst [vmem:[#allocation2 + $0x10] sm:$0x11] %v262_v46 }
  0x3b   : > { %1106 = vmatprep.subr.bf16.mxu1 %v3448_v49  ;;  %v277_v49 = vld [vmem:[%s3862_s27 + $0x38] sm:$0xff]  ;;  %v3352_v51 = vpack.c.bf16 %v275_v47, %v274_v43  ;;  %v283_v43 = vld [vmem:[%s3862_s27 + $0x68] sm:$0xff]  ;;  %v371_v47 = vshrl.u32 %v3355_v27, 16 }
  0x3c   : > { %v3353_v53 = vpack.c.bf16 %v277_v49, %v276_v48  ;;  %v284_v48 = vld [vmem:[%s3862_s27 + $0x70] sm:$0xff]  ;;  %v285_v49 = vld [vmem:[%s3862_s27 + $0x78] sm:$0xff] }
  0x3d   : > { %834 = vmatpush2.bf16.msra.mxu0 %v3450_v60  ;;  %v346_v58 = vshrl.u32 %v3352_v51, 16  ;;  %v349_v59 = vshll.u32 %v3352_v51, 16  ;;  %v3357_v4 = vpack.c.bf16 %v285_v49, %v284_v48 }
  0x3e   : > { %1107 = vmatpush2.bf16.msra.mxu1 %v3451_v61  ;;  %835 = vmatprep.subr.bf16.mxu0 %v3452_v5  ;;  %v354_v60 = vshrl.u32 %v3353_v53, 16  ;;  %v357_v61 = vshll.u32 %v3353_v53, 16  ;;  %v264_v5 = vld [vmem:[#allocation2 + $0x18] sm:$0x11]  ;;  %v374_v53 = vshll.u32 %v3355_v27, 16 }
  0x3f   : > { %1108 = vmatprep.subr.bf16.mxu1 %v3454_v6  ;;  %v348_v3 = vrot.slane %v346_v58, 7  ;;  %v265_v8 = vsel %vm3893_vm14, 0, %v264_v5  ;;  %v3476_v5 = vld [vmem:[%s4752_s1 + $0x250] ss:$8 sps:$4 sm:$0xff]   ;;  %v3484_v27 = vld [vmem:[%s4752_s1 + $0x234] ss:$8 sps:$4 sm:$0xff]  }
  0x40   : > { %v356_v6 = vrot.slane %v354_v60, 7  ;;  %266 = vst [vmem:[#allocation2 + $0x18] sm:$0x11] %v265_v8  ;;  %v373_v60 = vrot.slane %v371_v47, 7 }
  0x41   : > { %836 = vmatpush2.bf16.msra.mxu0 %v3456_v9  ;;  %v279_v9 = vld [vmem:[%s3862_s27 + $0x48] sm:$0xff]  ;;  %v351_v14 = vor.u32 %v349_v59, %v348_v3  ;;  %v424_v24 = vld [vmem:[#allocation2 + $0x10] sm:$0x11] }
  0x42   : > { %1109 = vmatpush2.bf16.msra.mxu1 %v3457_v13  ;;  %837 = vmatprep.subr.bf16.mxu0 %v3458_v15  ;;  %v511_v13 = vsel %vm3975_vm5, %v506_v56, %v510_v1  ;;  %v352_v15 = vrot.slane %v348_v3, 4  ;;  %v361_v22 = vrot.slane %v356_v6, 4  ;;  %v251_v56 = vsel %vm3873_vm8, 0, %v250_v35 }
  0x43   : > { %1110 = vmatprep.subr.bf16.mxu1 %v3460_v16  ;;  %v3354_v16 = vpack.c.bf16 %v279_v9, %v278_v63  ;;  %v2994_v17 = vcombine.low %v501_v0, %v511_v13  ;;  %v2995_v18 = vcombine.high %v501_v0, %v511_v13  ;;  %252 = vst [vmem:[#allocation2 + $0x48] sm:$0x11] %v251_v56  ;;  %v268_v1 = vsel %vm3893_vm14, 0, %v267_v41 }
  0x44   : > { %v425_v32 = vsel %vm3873_vm8, %v361_v22, %v424_v24  ;;  %v3356_v3 = vpack.c.bf16 %v283_v43, %v282_v42  ;;  %v376_v8 = vor.u32 %v374_v53, %v373_v60  ;;  %v378_v9 = vrot.slane %v373_v60, 4  ;;  %269 = vst [vmem:[#allocation2 + $0x58] sm:$0x11] %v268_v1  ;;  %v3487_v42 = vld [vmem:[%s4752_s1 + $0x224] ss:$8 sps:$4 sm:$0xff]  }
  0x45   : > { %838 = vmatpush2.bf16.msra.mxu0 %v3462_v19  ;;  %v3470_v19 = vld [vmem:[%s4752_s1 + $0x270] ss:$8 sps:$4 sm:$0xff]   ;;  %v363_v28 = vshrl.u32 %v3354_v16, 16  ;;  %v366_v29 = vshll.u32 %v3354_v16, 16  ;;  %841 = vmatprep.mubr.bf16.mxu0 %v2995_v18  ;;  %426 = vst [vmem:[#allocation2 + $0x10] sm:$0x11] %v425_v32 }
  0x46   : > { %1111 = vmatpush2.bf16.msra.mxu1 %v3463_v20  ;;  %839 = vmatprep.subr.bf16.mxu0 %v3464_v23  ;;  %v359_v20 = vor.u32 %v357_v61, %v356_v6  ;;  %v420_v23 = vld [vmem:[#allocation2] sm:$0xff]  ;;  %v427_v61 = vld [vmem:[#allocation2 + $0x50] sm:$0xff]  ;;  %v391_v41 = vshll.u32 %v3357_v4, 16 }
  0x47   : > { %1112 = vmatprep.subr.bf16.mxu1 %v3466_v30  ;;  %v421_v26 = vsel %vm3917_vm2, %v351_v14, %v420_v23  ;;  %v3473_v30 = vld [vmem:[%s4752_s1 + $0x260] ss:$8 sps:$4 sm:$0xff]   ;;  %v365_v46 = vrot.slane %v363_v28, 7  ;;  %v431_v0 = vld [vmem:[#allocation2 + $0x18] sm:$0x11] }
  0x48   : > { %v4005_v31 = vsel %vm3900_vm15, %v352_v15, %v359_v20  ;;  %422 = vst [vmem:[#allocation2] sm:$0xff] %v421_v26  ;;  %v513_v33 = vshrl.u32 %v421_v26, 16  ;;  %v516_v34 = vshll.u32 %v421_v26, 16  ;;  %v3481_v6 = vld [vmem:[%s4752_s1 + $0x244] ss:$8 sps:$4 sm:$0xff]   ;;  %v380_v15 = vshrl.u32 %v3356_v3, 16 }
  0x49   : > { %840 = vmatpush2.bf16.msra.mxu0 %v3468_v36  ;;  %v3478_v36 = vld [vmem:[%s4752_s1 + $0x254] ss:$8 sps:$4 sm:$0xff]   ;;  %v526_v38 = vshrl.u32 %v4005_v31, 16  ;;  %v3036_v40 = vcombine.low %v421_v26, %v4005_v31  ;;  %v368_v58 = vor.u32 %v366_v29, %v365_v46  ;;  %v369_v59 = vrot.slane %v365_v46, 4 }
  0x4a   : > { %1113 = vmatpush2.bf16.msra.mxu1 %v3469_v37  ;;  %1423 = vmatprep.subr.bf16.mxu0 %v3472_v39  ;;  %v522_v37 = vshll.u32 %v4005_v31, 16  ;;  %v3037_v39 = vcombine.high %v421_v26, %v4005_v31  ;;  %v518_v45 = vrot.slane %v516_v34, 5  ;;  %v383_v20 = vshll.u32 %v3356_v3, 16  ;;  %v3479_v26 = vld [vmem:[%s4752_s1 + $0x240] ss:$8 sps:$4 sm:$0xff]  }
  0x4b   : > { %v528_v51 = vrot.slane %v526_v38, 4  ;;  %v428_v10 = vsel %vm3917_vm2, %v368_v58, %v427_v61  ;;  %v4038_v18 = vsel %vm3900_vm15, %v369_v59, %v376_v8  ;;  %v382_v32 = vrot.slane %v380_v15, 7  ;;  %v3482_v38 = vld [vmem:[%s4752_s1 + $0x230] ss:$8 sps:$4 sm:$0xff]   ;;  %v3485_v58 = vld [vmem:[%s4752_s1 + $0x220] ss:$8 sps:$4 sm:$0xff]  }
  0x4c   : > { %842 = vmatmul.mubr.bf16.vlgmr.msra.gmra.mxu0 %v2994_v17  ;;  %v524_v50 = vrot.slane %v522_v37, 5  ;;  %429 = vst [vmem:[#allocation2 + $0x50] sm:$0xff] %v428_v10  ;;  %v537_v13 = vshrl.u32 %v428_v10, 16  ;;  %v540_v14 = vshll.u32 %v428_v10, 16  ;;  %v4032_v16 = vld [vmem:[#allocation2 + $0x10] sm:$0x11]  ;;  %v3039_v29 = vcombine.high %v428_v10, %v4038_v18 }
  0x4d   : > { %1115 = vmatmul.mubr.bf16.vlgmr.msra.gmra.mxu1 %v3034_v44  ;;  %1424 = vmatpush1.bf16.msra.mxu0 %v3470_v19  ;;  %v515_v44 = vrot.slane %v513_v33, 4  ;;  %v432_v19 = vsel %vm3873_vm8, %v378_v9, %v431_v0  ;;  %v532_v22 = vshll.u32 %v4032_v16, 16  ;;  %v550_v28 = vshrl.u32 %v4038_v18, 16  ;;  %v434_v37 = vld [vmem:[#allocation2 + $0x48] sm:$0xff] }
  0x4e   : > { %1425 = vmatprep.subr.bf16.mxu0 %v3475_v25  ;;  %1124 = vmatprep.mubr.bf16.mxu1 %v3037_v39  ;;  %v529_v63 = vor.u32 %v528_v51, %v524_v50  ;;  %433 = vst [vmem:[#allocation2 + $0x18] sm:$0x11] %v432_v19  ;;  %v539_v23 = vrot.slane %v537_v13, 4  ;;  %v542_v24 = vrot.slane %v540_v14, 5  ;;  %v546_v25 = vshll.u32 %v4038_v18, 16 }
  0x4f   : > { %v519_v57 = vor.u32 %v518_v45, %v515_v44  ;;  %v534_v33 = vrot.slane %v532_v22, 5  ;;  %v552_v39 = vrot.slane %v550_v28, 4  ;;  %v386_v44 = vrot.slane %v382_v32, 4  ;;  %v3488_v14 = vld [vmem:[%s4752_s1 + $0x210] ss:$8 sps:$4 sm:$0xff]  }
  0x50   : > { %v530_v11 = vrot.slane %v529_v63, 4  ;;  %v543_v34 = vor.u32 %v542_v24, %v539_v23  ;;  %v548_v35 = vrot.slane %v546_v25, 5  ;;  %v3490_v63 = vld [vmem:[%s4752_s1 + $0x214] ss:$8 sps:$4 sm:$0xff]   ;;  %v3493_v22 = vld [vmem:[%s4752_s1 + $0x204] ss:$8 sps:$4 sm:$0xff]  }
  0x51   : > { %1426 = vmatpush1.bf16.msra.mxu0 %v3473_v30  ;;  %v520_v7 = vrot.slane %v519_v57, 4  ;;  %v3038_v30 = vcombine.low %v428_v10, %v4038_v18  ;;  %v3491_v28 = vld [vmem:[%s4752_s1 + $0x200] ss:$8 sps:$4 sm:$0xff]  }
  0x52   : > { %1427 = vmatprep.subr.bf16.mxu0 %v3478_v36  ;;  %v388_v36 = vshrl.u32 %v3357_v4, 16  ;;  %v535_v43 = vsel %vm3975_vm5, %v530_v11, %v534_v33  ;;  %v553_v48 = vor.u32 %v552_v39, %v548_v35  ;;  %v544_v51 = vrot.slane %v543_v34, 4  ;;  %v3499_v39 = vld [vmem:[%s4752_s1 + $0x2e4] ss:$8 sps:$4 sm:$0xff]  }
  0x53   : > { %v525_v17 = vsel %vm3975_vm5, %v520_v7, %v524_v50  ;;  %v438_v50 = vld [vmem:[#allocation2 + $0x58] sm:$0x11] }
  0x54   : > { %v390_v45 = vrot.slane %v388_v36, 7  ;;  %v2997_v46 = vcombine.high %v525_v17, %v535_v43  ;;  %v2996_v47 = vcombine.low %v525_v17, %v535_v43  ;;  %v554_v60 = vrot.slane %v553_v48, 4  ;;  %v3500_v48 = vld [vmem:[%s4752_s1 + $0x2d0] ss:$8 sps:$4 sm:$0xff]  }
  0x55   : > { %1125 = vmatmul.mubr.bf16.gmra.mxu1 %v3036_v40  ;;  %1428 = vmatpush1.bf16.msra.mxu0 %v3476_v5  ;;  %v385_v40 = vor.u32 %v383_v20, %v382_v32  ;;  %v4066_v59 = vld [vmem:[#allocation2 + $0x18] sm:$0x11]  ;;  %v549_v10 = vsel %vm3975_vm5, %v544_v51, %v548_v35  ;;  %v1172_v20 = vrot.slane %v3938_v21, 5 }
  0x56   : > { %1429 = vmatprep.subr.bf16.mxu0 %v3481_v6  ;;  %1134 = vmatprep.mubr.bf16.mxu1 %v3039_v29  ;;  %v393_v53 = vor.u32 %v391_v41, %v390_v45  ;;  %v395_v56 = vrot.slane %v390_v45, 4  ;;  %v556_v0 = vshll.u32 %v4066_v59, 16  ;;  %v3496_v32 = vld [vmem:[%s4752_s1 + $0x2f4] ss:$8 sps:$4 sm:$0xff]   ;;  %v3497_v45 = vld [vmem:[%s4752_s1 + $0x2e0] ss:$8 sps:$4 sm:$0xff]  }
  0x57   : > { %v435_v49 = vsel %vm3917_vm2, %v385_v40, %v434_v37  ;;  %851 = vmatprep.mubr.bf16.mxu0 %v2997_v46  ;;  %v1174_v29 = vrot.slane %v1172_v20, 4  ;;  %v3494_v37 = vld [vmem:[%s4752_s1 + $0x2f0] ss:$8 sps:$4 sm:$0xff]   ;;  %v3508_v51 = vld [vmem:[%s4752_s1 + $0x2b4] ss:$8 sps:$4 sm:$0xff]  }
  0x58   : > { %436 = vst [vmem:[#allocation2 + $0x48] sm:$0xff] %v435_v49  ;;  %v561_v57 = vshrl.u32 %v435_v49, 16  ;;  %v564_v61 = vshll.u32 %v435_v49, 16  ;;  %852 = vmatmul.mubr.bf16.gmra.mxu0 %v2996_v47  ;;  %v4074_v1 = vsel %vm3900_vm15, %v386_v44, %v393_v53  ;;  %v439_v3 = vsel %vm3873_vm8, %v395_v56, %v438_v50  ;;  %v3502_v47 = vld [vmem:[%s4752_s1 + $0x2d4] ss:$8 sps:$4 sm:$0xff]  }
  0x59   : > { %1430 = vmatpush1.bf16.msra.mxu0 %v3479_v26  ;;  %440 = vst [vmem:[#allocation2 + $0x58] sm:$0x11] %v439_v3  ;;  %v570_v6 = vshll.u32 %v4074_v1, 16  ;;  %v574_v7 = vshrl.u32 %v4074_v1, 16  ;;  %v3041_v8 = vcombine.high %v435_v49, %v4074_v1  ;;  %v558_v11 = vrot.slane %v556_v0, 5 }
  0x5a   : > { %1431 = vmatprep.subr.bf16.mxu0 %v3484_v27  ;;  %v563_v4 = vrot.slane %v561_v57, 4  ;;  %v566_v5 = vrot.slane %v564_v61, 5  ;;  %v3040_v13 = vcombine.low %v435_v49, %v4074_v1  ;;  %v1155_v27 = vld [vmem:[#allocation2 + $0x40] sm:$0xee]  ;;  %v3506_v53 = vld [vmem:[%s4752_s1 + $0x2b0] ss:$8 sps:$4 sm:$0xff]  }
  0x5b   : > { %v572_v17 = vrot.slane %v570_v6, 5  ;;  %v576_v19 = vrot.slane %v574_v7, 4  ;;  %v559_v23 = vsel %vm3975_vm5, %v554_v60, %v558_v11  ;;  %v3074_v34 = vrot.slane %v1155_v27, 9  ;;  %v3505_v49 = vld [vmem:[%s4752_s1 + $0x2c4] ss:$8 sps:$4 sm:$0xff]  }
  0x5c   : > { %v567_v15 = vor.u32 %v566_v5, %v563_v4  ;;  %v2999_v24 = vcombine.high %v549_v10, %v559_v23  ;;  %v2998_v25 = vcombine.low %v549_v10, %v559_v23  ;;  %v3503_v50 = vld [vmem:[%s4752_s1 + $0x2c0] ss:$8 sps:$4 sm:$0xff]   ;;  %v3511_v56 = vld [vmem:[%s4752_s1 + $0x2a4] ss:$8 sps:$4 sm:$0xff]   ;;  %v1179_v60 = vrot.slane %v4005_v31, 5 }
  0x5d   : > { %1135 = vmatmul.mubr.bf16.gmra.mxu1 %v3038_v30  ;;  %1432 = vmatpush1.bf16.msra.mxu0 %v3482_v38  ;;  %v577_v26 = vor.u32 %v576_v19, %v572_v17  ;;  %v1175_v30 = vrot.slane %v3971_v54, 5  ;;  %v1173_v40 = vsel %vm4083_vm9, %v3074_v34, %v1172_v20  ;;  %v3509_v57 = vld [vmem:[%s4752_s1 + $0x2a0] ss:$8 sps:$4 sm:$0xff]   ;;  %v3517_v0 = vld [vmem:[%s4752_s1 + $0x284] ss:$8 sps:$4 sm:$0xff]   ;;  %v1182_v5 = vrot.slane %v4032_v16, 5 }
  0x5e   : > { %1433 = vmatprep.subr.bf16.mxu0 %v3487_v42  ;;  %1144 = vmatprep.mubr.bf16.mxu1 %v3041_v8  ;;  %v568_v21 = vrot.slane %v567_v15, 4  ;;  %v1156_v61 = vld [vmem:[#allocation2] sm:$0xee]  ;;  %v1181_v4 = vrot.slane %v1179_v60, 4  ;;  %v1186_v8 = vrot.slane %v4038_v18, 5  ;;  %v1189_v15 = vrot.slane %v4066_v59, 5 }
  0x5f   : > { %861 = vmatprep.mubr.bf16.mxu0 %v2999_v24  ;;  %v578_v35 = vrot.slane %v577_v26, 4  ;;  %v1176_v41 = vsel %vm4083_vm9, %v1174_v29, %v1175_v30  ;;  %v3075_v3 = vrot.slane %v1156_v61, 9  ;;  %v3515_v31 = vld [vmem:[%s4752_s1 + $0x280] ss:$8 sps:$4 sm:$0xff]   ;;  %v1157_v10 = vld [vmem:[#allocation2 + $0x50] sm:$0xee] }
  0x60   : > { %862 = vmatmul.mubr.bf16.gmra.mxu0 %v2998_v25  ;;  %v4106_v33 = vld [vmem:[#allocation2 + $0x58] sm:$0x11]  ;;  %v573_v54 = vsel %vm3975_vm5, %v568_v21, %v572_v17  ;;  %v3111_v46 = vcombine.high %v1173_v40, %v1176_v41  ;;  %v1183_v7 = vsel %vm4083_vm9, %v1181_v4, %v1182_v5  ;;  %v3110_v11 = vcombine.low %v1173_v40, %v1176_v41  ;;  %v3521_v30 = vld [vmem:[%s4754_s3 + $0x60] ss:$8 sps:$4 sm:$0xff]   ;;  %v3535_v40 = vld [vmem:[%s4754_s3 + $0x44] ss:$8 sps:$4 sm:$0xff]  }
  0x61   : > { %1434 = vmatpush1.bf16.msra.mxu0 %v3485_v58  ;;  %v580_v36 = vshll.u32 %v4106_v33, 16  ;;  %v3514_v58 = vld [vmem:[%s4752_s1 + $0x294] ss:$8 sps:$4 sm:$0xff]   ;;  %v1180_v6 = vsel %vm4083_vm9, %v3075_v3, %v1179_v60  ;;  %v1188_v16 = vrot.slane %v1186_v8, 4  ;;  %v1193_v20 = vrot.slane %v4074_v1, 5 }
  0x62   : > { %1435 = vmatprep.subr.bf16.mxu0 %v3490_v63  ;;  %v3512_v63 = vld [vmem:[%s4752_s1 + $0x290] ss:$8 sps:$4 sm:$0xff]   ;;  %v3112_v18 = vcombine.low %v1180_v6, %v1183_v7  ;;  %v1196_v26 = vrot.slane %v4106_v33, 5  ;;  %v3520_v27 = vld [vmem:[%s4754_s3 + $0x74] ss:$8 sps:$4 sm:$0xff]  }
  0x63   : > { %v582_v38 = vrot.slane %v580_v36, 5  ;;  %v1190_v19 = vsel %vm4083_vm9, %v1188_v16, %v1189_v15  ;;  %v1195_v25 = vrot.slane %v1193_v20, 4  ;;  %v3518_v59 = vld [vmem:[%s4754_s3 + $0x70] ss:$8 sps:$4 sm:$0xff]   ;;  %v3557_v60 = vld [vmem:[%s4754_s3] ss:$8 sps:$4 sm:$0xff]  }
  0x64   : > { %v3524_v34 = vld [vmem:[%s4754_s3 + $0x170] ss:$8 sps:$4 sm:$0xff]   ;;  %v3565_v61 = vld [vmem:[%s4754_s3 + $0xf4] ss:$8 sps:$4 sm:$0xff]   ;;  %v3571_v3 = vld [vmem:[%s4754_s3 + $0xe4] ss:$8 sps:$4 sm:$0xff]  }
  0x65   : > { %1145 = vmatmul.mubr.bf16.gmra.mxu1 %v3040_v13  ;;  %1436 = vmatpush1.bf16.msra.mxu0 %v3488_v14  ;;  %v583_v42 = vsel %vm3975_vm5, %v578_v35, %v582_v38  ;;  %v3113_v13 = vcombine.high %v1180_v6, %v1183_v7  ;;  %v3076_v14 = vrot.slane %v1157_v10, 9  ;;  %v3526_v35 = vld [vmem:[%s4754_s3 + $0x174] ss:$8 sps:$4 sm:$0xff]   ;;  %v3527_v36 = vld [vmem:[%s4754_s3 + $0x50] ss:$8 sps:$4 sm:$0xff]  }
  0x66   : > { %1437 = vmatprep.subr.bf16.mxu0 %v3493_v22  ;;  %v3001_v43 = vcombine.high %v573_v54, %v583_v42  ;;  %v3000_v44 = vcombine.low %v573_v54, %v583_v42  ;;  %v1158_v22 = vld [vmem:[#allocation2 + $0x48] sm:$0xee]  ;;  %2109 = vmatprep.subr.bf16.mxu1 %v3526_v35  ;;  %v3536_v41 = vld [vmem:[%s4754_s3 + $0x150] ss:$8 sps:$4 sm:$0xff]   ;;  %v3538_v42 = vld [vmem:[%s4754_s3 + $0x154] ss:$8 sps:$4 sm:$0xff]  }
  0x67   : > { %v1187_v17 = vsel %vm4083_vm9, %v3076_v14, %v1186_v8  ;;  %v3077_v24 = vrot.slane %v1158_v22, 9  ;;  %2110 = vmatpush1.bf16.msra.mxu1 %v3524_v34  ;;  %v3530_v54 = vld [vmem:[%s4754_s3 + $0x160] ss:$8 sps:$4 sm:$0xff]   ;;  %v3532_v38 = vld [vmem:[%s4754_s3 + $0x164] ss:$8 sps:$4 sm:$0xff]  }
  0x68   : > { %871 = vmatprep.mubr.bf16.mxu0 %v3001_v43  ;;  %v3115_v23 = vcombine.high %v1187_v17, %v1190_v19  ;;  %v3114_v21 = vcombine.low %v1187_v17, %v1190_v19  ;;  %2111 = vmatprep.subr.bf16.mxu1 %v3532_v38  ;;  %v3539_v43 = vld [vmem:[%s4754_s3 + $0x30] ss:$8 sps:$4 sm:$0xff]   ;;  %v3569_v5 = vld [vmem:[%s4754_s3 + $0xe0] ss:$8 sps:$4 sm:$0xff]   ;;  %v3577_v6 = vld [vmem:[%s4754_s3 + $0xd4] ss:$8 sps:$4 sm:$0xff]  }
  0x69   : > { %1438 = vmatpush1.bf16.msra.mxu0 %v3491_v28  ;;  %v1194_v1 = vsel %vm4083_vm9, %v3077_v24, %v1193_v20  ;;  %v1197_v28 = vsel %vm4083_vm9, %v1195_v25, %v1196_v26  ;;  %v3560_v4 = vld [vmem:[%s4754_s3 + $0x110] ss:$8 sps:$4 sm:$0xff]   ;;  %v3566_v7 = vld [vmem:[%s4754_s3 + $0x100] ss:$8 sps:$4 sm:$0xff]   ;;  %v3574_v10 = vld [vmem:[%s4754_s3 + $0x1f4] ss:$8 sps:$4 sm:$0xff]  }
  0x6a   : > { %1439 = vmatprep.subr.bf16.mxu0 %v3496_v32  ;;  %872 = vmatmul.mubr.bf16.gmra.mxu0 %v3000_v44  ;;  %v3117_v29 = vcombine.high %v1194_v1, %v1197_v28  ;;  %v3523_v32 = vld [vmem:[%s4754_s3 + $0x64] ss:$8 sps:$4 sm:$0xff]   ;;  %v3116_v33 = vcombine.low %v1194_v1, %v1197_v28  ;;  %v3541_v44 = vld [vmem:[%s4754_s3 + $0x34] ss:$8 sps:$4 sm:$0xff]   ;;  %v3575_v8 = vld [vmem:[%s4754_s3 + $0xd0] ss:$8 sps:$4 sm:$0xff]  }
  0x6b   : > { %1455 = vmatprep.mubr.bf16.mxu0 %v3111_v46  ;;  %2112 = vmatpush1.bf16.msra.mxu1 %v3530_v54  ;;  %v3544_v46 = vld [vmem:[%s4754_s3 + $0x144] ss:$8 sps:$4 sm:$0xff]   ;;  %v3581_v14 = vld [vmem:[%s4754_s3 + $0xc0] ss:$8 sps:$4 sm:$0xff]   ;;  %v3589_v19 = vld [vmem:[%s4754_s3 + $0xb4] ss:$8 sps:$4 sm:$0xff]  }
  0x6c   : > { %2113 = vmatprep.subr.bf16.mxu1 %v3538_v42  ;;  %v1556_v16 = vld [vmem:[#allocation3 + $0x20] sm:$0x11]  ;;  %v3587_v22 = vld [vmem:[%s4754_s3 + $0xb0] ss:$8 sps:$4 sm:$0xff]   ;;  %v3586_v24 = vld [vmem:[%s4754_s3 + $0x1d4] ss:$8 sps:$4 sm:$0xff]  }
  0x6d   : > { %1440 = vmatpush2.bf16.msra.mxu0 %v3494_v37  ;;  %v3529_v37 = vld [vmem:[%s4754_s3 + $0x54] ss:$8 sps:$4 sm:$0xff]   ;;  %v1557_v15 = vsel %vm3873_vm8, 0, %v1556_v16  ;;  %v3580_v17 = vld [vmem:[%s4754_s3 + $0x1e4] ss:$8 sps:$4 sm:$0xff]  }
  0x6e   : > { %1441 = vmatprep.subr.bf16.mxu0 %v3499_v39  ;;  %v3533_v39 = vld [vmem:[%s4754_s3 + $0x40] ss:$8 sps:$4 sm:$0xff]   ;;  %1558 = vst [vmem:[#allocation3 + $0x20] sm:$0x11] %v1557_v15  ;;  %v3584_v25 = vld [vmem:[%s4754_s3 + $0x1d0] ss:$8 sps:$4 sm:$0xff]  }
  0x6f   : > { %2114 = vmatpush1.bf16.msra.mxu1 %v3536_v41  ;;  %v3578_v20 = vld [vmem:[%s4754_s3 + $0x1e0] ss:$8 sps:$4 sm:$0xff]   ;;  %v3595_v26 = vld [vmem:[%s4754_s3 + $0xa4] ss:$8 sps:$4 sm:$0xff]   ;;  %v3598_v34 = vld [vmem:[%s4754_s3 + $0x1b4] ss:$8 sps:$4 sm:$0xff]  }
  0x70   : > { %2115 = vmatprep.subr.bf16.mxu1 %v3544_v46  ;;  %v3592_v28 = vld [vmem:[%s4754_s3 + $0x1c4] ss:$8 sps:$4 sm:$0xff]   ;;  %v1562_v54 = vld [vmem:[#allocation3 + $0x38] sm:$0x11] }
  0x71   : > { %1442 = vmatpush2.bf16.msra.mxu0 %v3497_v45  ;;  %v3542_v45 = vld [vmem:[%s4754_s3 + $0x140] ss:$8 sps:$4 sm:$0xff]   ;;  %v3607_v35 = vld [vmem:[%s4754_s3 + $0x84] ss:$8 sps:$4 sm:$0xff]   ;;  %v1563_v38 = vsel %vm3873_vm8, 0, %v1562_v54 }
  0x72   : > { %1443 = vmatprep.subr.bf16.mxu0 %v3502_v47  ;;  %v3545_v47 = vld [vmem:[%s4754_s3 + $0x20] ss:$8 sps:$4 sm:$0xff]   ;;  %1564 = vst [vmem:[#allocation3 + $0x38] sm:$0x11] %v1563_v38  ;;  %v3610_v42 = vld [vmem:[%s4754_s3 + $0x194] ss:$8 sps:$4 sm:$0xff]  }
  0x73   : > { %2116 = vmatpush1.bf16.msra.mxu1 %v3542_v45  ;;  %v1574_v41 = vld [vmem:[#allocation3 + $0x48] sm:$0x11]  ;;  %v1565_v45 = vld [vmem:[#allocation3 + $0x40] sm:$0x11] }
  0x74   : > { %v3613_v46 = vld [vmem:[%s4754_s3 + $0x184] ss:$8 sps:$4 sm:$0xff]  }
  0x75   : > { %1444 = vmatpush2.bf16.msra.mxu0 %v3500_v48  ;;  %v3547_v48 = vld [vmem:[%s4754_s3 + $0x24] ss:$8 sps:$4 sm:$0xff]  }
  0x76   : > { %1445 = vmatprep.subr.bf16.mxu0 %v3505_v49  ;;  %v3548_v49 = vld [vmem:[%s4754_s3 + $0x130] ss:$8 sps:$4 sm:$0xff]  }
  0x79   : > { %1446 = vmatpush2.bf16.msra.mxu0 %v3503_v50  ;;  %v3550_v50 = vld [vmem:[%s4754_s3 + $0x134] ss:$8 sps:$4 sm:$0xff]  }
  0x7a   : > { %1447 = vmatprep.subr.bf16.mxu0 %v3508_v51  ;;  %v3551_v51 = vld [vmem:[%s4754_s3 + $0x10] ss:$8 sps:$4 sm:$0xff]   ;;  %2117 = vmatprep.subr.bf16.mxu1 %v3550_v50 }
  0x7b   : > { %2118 = vmatpush1.bf16.msra.mxu1 %v3548_v49  ;;  %v1577_v49 = vld [vmem:[#allocation3 + $0x8] sm:$0x11] }
  0x7c   : > { %v1578_v50 = vsel %vm3893_vm14, 0, %v1577_v49 }
  0x7d   : > { %1448 = vmatpush2.bf16.msra.mxu0 %v3506_v53  ;;  %v3553_v53 = vld [vmem:[%s4754_s3 + $0x14] ss:$8 sps:$4 sm:$0xff]   ;;  %1579 = vst [vmem:[#allocation3 + $0x8] sm:$0x11] %v1578_v50 }
  0x7e   : > { %1449 = vmatprep.subr.bf16.mxu0 %v3511_v56  ;;  %v3556_v56 = vld [vmem:[%s4754_s3 + $0x124] ss:$8 sps:$4 sm:$0xff]  }
  0x7f   : > { %2119 = vmatprep.subr.bf16.mxu1 %v3556_v56 }
  0x81   : > { %1450 = vmatpush2.bf16.msra.mxu0 %v3509_v57  ;;  %v3559_v57 = vld [vmem:[%s4754_s3 + $0x4] ss:$8 sps:$4 sm:$0xff]  }
  0x82   : > { %1451 = vmatprep.subr.bf16.mxu0 %v3514_v58  ;;  %v3554_v58 = vld [vmem:[%s4754_s3 + $0x120] ss:$8 sps:$4 sm:$0xff]  }
  0x83   : > { %2120 = vmatpush1.bf16.msra.mxu1 %v3554_v58 }
  0x85   : > { %1452 = vmatpush2.bf16.msra.mxu0 %v3512_v63  ;;  %v3563_v63 = vld [vmem:[%s4754_s3 + $0xf0] ss:$8 sps:$4 sm:$0xff]  }
  0x86   : > { %1453 = vmatprep.subr.bf16.mxu0 %v3517_v0  ;;  %v3562_v0 = vld [vmem:[%s4754_s3 + $0x114] ss:$8 sps:$4 sm:$0xff]  }
  0x87   : > { %2121 = vmatprep.subr.bf16.mxu1 %v3562_v0 }
  0x88   : > { %2122 = vmatpush1.bf16.msra.mxu1 %v3560_v4 }
  0x89   : > { %1454 = vmatpush2.bf16.msra.mxu0 %v3515_v31  ;;  %v3568_v31 = vld [vmem:[%s4754_s3 + $0x104] ss:$8 sps:$4 sm:$0xff]  }
  0x8a   : > { %2382 = vmatprep.subr.bf16.mxu0 %v3520_v27  ;;  %2123 = vmatprep.subr.bf16.mxu1 %v3568_v31  ;;  %v1559_v27 = vld [vmem:[#allocation3] sm:$0x11] }
  0x8b   : > { %v1560_v1 = vsel %vm3873_vm8, 0, %v1559_v27 }
  0x8c   : > { %1456 = vmatmul.mubr.bf16.vlgmr.msra.gmra.mxu0 %v3110_v11  ;;  %2124 = vmatpush1.bf16.msra.mxu1 %v3566_v7  ;;  %v3572_v11 = vld [vmem:[%s4754_s3 + $0x1f0] ss:$8 sps:$4 sm:$0xff]   ;;  %1561 = vst [vmem:[#allocation3] sm:$0x11] %v1560_v1 }
  0x8d   : > { %1465 = vmatprep.mubr.bf16.mxu0 %v3113_v13  ;;  %2383 = vmatpush1.bf16.msra.mxu0 %v3518_v59  ;;  %v3583_v13 = vld [vmem:[%s4754_s3 + $0xc4] ss:$8 sps:$4 sm:$0xff]   ;;  %v3593_v59 = vld [vmem:[%s4754_s3 + $0xa0] ss:$8 sps:$4 sm:$0xff]  }
  0x8e   : > { %2384 = vmatprep.subr.bf16.mxu0 %v3523_v32  ;;  %2125 = vmatprep.subr.bf16.mxu1 %v3574_v10  ;;  %v1571_v32 = vld [vmem:[#allocation3 + $0x10] sm:$0x11] }
  0x90   : > { %2126 = vmatpush2.bf16.msra.mxu1 %v3572_v11 }
  0x91   : > { %2385 = vmatpush1.bf16.msra.mxu0 %v3521_v30  ;;  %2127 = vmatprep.subr.bf16.mxu1 %v3580_v17  ;;  %v3599_v30 = vld [vmem:[%s4754_s3 + $0x90] ss:$8 sps:$4 sm:$0xff]   ;;  %v1514_v17 = vlaneseq }
  0x92   : > { %2386 = vmatprep.subr.bf16.mxu0 %v3529_v37  ;;  %v3605_v37 = vld [vmem:[%s4754_s3 + $0x80] ss:$8 sps:$4 sm:$0xff]  }
  0x94   : > { %1466 = vmatmul.mubr.bf16.gmra.mxu0 %v3112_v18  ;;  %v1568_v18 = vld [vmem:[#allocation3 + $0x18] sm:$0x11]  ;;  %2128 = vmatpush2.bf16.msra.mxu1 %v3578_v20 }
  0x95   : > { %1475 = vmatprep.mubr.bf16.mxu0 %v3115_v23  ;;  %2387 = vmatpush1.bf16.msra.mxu0 %v3527_v36  ;;  %v1569_v23 = vsel %vm3893_vm14, 0, %v1568_v18  ;;  %v3596_v36 = vld [vmem:[%s4754_s3 + $0x1b0] ss:$8 sps:$4 sm:$0xff]  }
  0x96   : > { %2388 = vmatprep.subr.bf16.mxu0 %v3535_v40  ;;  %1570 = vst [vmem:[#allocation3 + $0x18] sm:$0x11] %v1569_v23  ;;  %2129 = vmatprep.subr.bf16.mxu1 %v3586_v24  ;;  %v3602_v40 = vld [vmem:[%s4754_s3 + $0x1a0] ss:$8 sps:$4 sm:$0xff]  }
  0x98   : > { %2130 = vmatpush2.bf16.msra.mxu1 %v3584_v25 }
  0x99   : > { %2389 = vmatpush1.bf16.msra.mxu0 %v3533_v39  ;;  %2131 = vmatprep.subr.bf16.mxu1 %v3592_v28  ;;  %v3604_v39 = vld [vmem:[%s4754_s3 + $0x1a4] ss:$8 sps:$4 sm:$0xff]  }
  0x9a   : > { %2390 = vmatprep.subr.bf16.mxu0 %v3541_v44  ;;  %v3608_v44 = vld [vmem:[%s4754_s3 + $0x190] ss:$8 sps:$4 sm:$0xff]  }
  0x9c   : > { %1476 = vmatmul.mubr.bf16.gmra.mxu0 %v3114_v21  ;;  %v3601_v21 = vld [vmem:[%s4754_s3 + $0x94] ss:$8 sps:$4 sm:$0xff]  }
  0x9d   : > { %1485 = vmatprep.mubr.bf16.mxu0 %v3117_v29  ;;  %2391 = vmatpush1.bf16.msra.mxu0 %v3539_v43  ;;  %v3590_v29 = vld [vmem:[%s4754_s3 + $0x1c0] ss:$8 sps:$4 sm:$0xff]   ;;  %v1575_v43 = vsel %vm3893_vm14, 0, %v1574_v41 }
  0x9e   : > { %2392 = vmatprep.subr.bf16.mxu0 %v3547_v48  ;;  %2132 = vmatpush2.bf16.msra.mxu1 %v3590_v29  ;;  %1576 = vst [vmem:[#allocation3 + $0x48] sm:$0x11] %v1575_v43  ;;  %v3611_v48 = vld [vmem:[%s4754_s3 + $0x180] ss:$8 sps:$4 sm:$0xff]  }
  0x9f   : > { %2133 = vmatprep.subr.bf16.mxu1 %v3598_v34 }
  0xa1   : > { %2393 = vmatpush1.bf16.msra.mxu0 %v3545_v47  ;;  %v1566_v47 = vsel %vm3873_vm8, 0, %v1565_v45 }
  0xa2   : > { %2394 = vmatprep.subr.bf16.mxu0 %v3553_v53  ;;  %2134 = vmatpush2.bf16.msra.mxu1 %v3596_v36  ;;  %1567 = vst [vmem:[#allocation3 + $0x40] sm:$0x11] %v1566_v47 }
  0xa3   : > { %2135 = vmatprep.subr.bf16.mxu1 %v3604_v39 }
  0xa4   : > { %1486 = vmatmul.mubr.bf16.gmra.mxu0 %v3116_v33  ;;  %v1572_v33 = vsel %vm3893_vm14, 0, %v1571_v32 }
  0xa5   : > { %2395 = vmatpush1.bf16.msra.mxu0 %v3551_v51  ;;  %1573 = vst [vmem:[#allocation3 + $0x10] sm:$0x11] %v1572_v33  ;;  %v3616_v51 = vld [vmem:[%s4754_s3 + $0x274] ss:$8 sps:$4 sm:$0xff]  }
  0xa6   : > { %2396 = vmatprep.subr.bf16.mxu0 %v3559_v57  ;;  %2136 = vmatpush2.bf16.msra.mxu1 %v3602_v40 }
  0xa7   : > { %2137 = vmatprep.subr.bf16.mxu1 %v3610_v42 }
  0xa9   : > { %2397 = vmatpush1.bf16.msra.mxu0 %v3557_v60 }
  0xaa   : > { %2398 = vmatprep.subr.bf16.mxu0 %v3565_v61  ;;  %2138 = vmatpush2.bf16.msra.mxu1 %v3608_v44 }
  0xab   : > { %2139 = vmatprep.subr.bf16.mxu1 %v3613_v46 }
  0xad   : > { %2399 = vmatpush2.bf16.msra.mxu0 %v3563_v63 }
  0xae   : > { %2400 = vmatprep.subr.bf16.mxu0 %v3571_v3  ;;  %2140 = vmatpush2.bf16.msra.mxu1 %v3611_v48 }
  0xaf   : > { %2720 = vmatprep.subr.bf16.mxu1 %v3616_v51 }
  0xb1   : > { %2401 = vmatpush2.bf16.msra.mxu0 %v3569_v5 }
  0xb2   : > { %2402 = vmatprep.subr.bf16.mxu0 %v3577_v6 }
  0xb5   : > { %2403 = vmatpush2.bf16.msra.mxu0 %v3575_v8 }
  0xb6   : > { %2404 = vmatprep.subr.bf16.mxu0 %v3583_v13 }
  0xb9   : > { %2405 = vmatpush2.bf16.msra.mxu0 %v3581_v14 }
  0xba   : > { %2406 = vmatprep.subr.bf16.mxu0 %v3589_v19 }
  0xbd   : > { %2407 = vmatpush2.bf16.msra.mxu0 %v3587_v22  ;;  %v4391_v22 = vshrl.u32 %v1514_v17, 7 }
  0xbe   : > { %2408 = vmatprep.subr.bf16.mxu0 %v3595_v26  ;;  %v1512_v26 = vld [vmem:[%s4753_s2] sm:$0x3] }
  0xbf   : > { %v1516_v24 = vsub.s32 0, %v4391_v22 }
  0xc1   : > { %2409 = vmatpush2.bf16.msra.mxu0 %v3593_v59  ;;  %v1520_v59 = vsub.s32 1, %v4391_v22  ;;  %v4400_v28 = vrot.slane %v1512_v26, %v1516_v24  ;;  %v1730_v22 = vld [vmem:[%s3862_s27 + $0x10] sm:$0xff] }
  0xc2   : > { %2410 = vmatprep.subr.bf16.mxu0 %v3601_v21 }
  0xc3   : > { %v4404_v33 = vrot.slane %v1512_v26, %v1520_v59 }
  0xc5   : > { %2411 = vmatpush2.bf16.msra.mxu0 %v3599_v30 }
  0xc6   : > { %2412 = vmatprep.subr.bf16.mxu0 %v3607_v35 }
  0xc9   : > { %2413 = vmatpush2.bf16.msra.mxu0 %v3605_v37 }
 0x10c   : > { %v843_v53 = vpop.f32.mrf.mxu0 }
 0x10d   : > { %v1116_v60 = vpop.f32.mrf.mxu1 }
 0x10e   : > { %v845_v56 = vpop.f32.mrf.mxu0  ;;  %v1117_v1 = vadd.f32 %v1116_v60, %v843_v53 }
 0x10f   : > { %v1118_v63 = vpop.f32.mrf.mxu1 }
 0x110   : > { %v847_v57 = vpop.f32.mrf.mxu0  ;;  %v1119_v30 = vadd.f32 %v1118_v63, %v845_v56 }
 0x111   : > { %v1120_v3 = vpop.f32.mrf.mxu1 }
 0x112   : > { %v849_v58 = vpop.f32.mrf.mxu0  ;;  %v1121_v35 = vadd.f32 %v1120_v3, %v847_v57 }
 0x113   : > { %v1122_v5 = vpop.f32.mrf.mxu1 }
 0x114   : > { %v1123_v39 = vadd.f32 %v1122_v5, %v849_v58 }
 0x115   : > { %v1126_v62 = vpop.f32.mrf.mxu1 }
 0x117   : > { %v1128_v7 = vpop.f32.mrf.mxu1 }
 0x118   : > { %v853_v61 = vpop.f32.mrf.mxu0 }
 0x119   : > { %v1130_v10 = vpop.f32.mrf.mxu1  ;;  %v1127_v42 = vadd.f32 %v1126_v62, %v853_v61 }
 0x11a   : > { %v855_v0 = vpop.f32.mrf.mxu0 }
 0x11b   : > { %v1132_v13 = vpop.f32.mrf.mxu1  ;;  %v1129_v56 = vadd.f32 %v1128_v7, %v855_v0 }
 0x11c   : > { %v857_v4 = vpop.f32.mrf.mxu0 }
 0x11d   : > { %v1136_v16 = vpop.f32.mrf.mxu1  ;;  %v1131_v57 = vadd.f32 %v1130_v10, %v857_v4 }
 0x11e   : > { %v859_v31 = vpop.f32.mrf.mxu0 }
 0x11f   : > { %v1138_v19 = vpop.f32.mrf.mxu1  ;;  %v1133_v60 = vadd.f32 %v1132_v13, %v859_v31 }
 0x120   : > { %v863_v6 = vpop.f32.mrf.mxu0 }
 0x121   : > { %v1140_v18 = vpop.f32.mrf.mxu1  ;;  %v1137_v58 = vadd.f32 %v1136_v16, %v863_v6  ;;  %v1700_v6 = vld [vmem:[#allocation3 + $0x20] sm:$0xff] }
 0x122   : > { %v865_v8 = vpop.f32.mrf.mxu0 }
 0x123   : > { %v1142_v25 = vpop.f32.mrf.mxu1  ;;  %v1139_v17 = vadd.f32 %v1138_v19, %v865_v8 }
 0x124   : > { %v867_v11 = vpop.f32.mrf.mxu0 }
 0x125   : > { %v1146_v21 = vpop.f32.mrf.mxu1  ;;  %v1141_v26 = vadd.f32 %v1140_v18, %v867_v11 }
 0x126   : > { %v869_v14 = vpop.f32.mrf.mxu0 }
 0x127   : > { %v1148_v54 = vpop.f32.mrf.mxu1 }
 0x129   : > { %v1150_v48 = vpop.f32.mrf.mxu1 }
 0x12a   : > { %v873_v15 = vpop.f32.mrf.mxu0 }
 0x12b   : > { %v1147_v0 = vadd.f32 %v1146_v21, %v873_v15 }
 0x12c   : > { %v875_v20 = vpop.f32.mrf.mxu0 }
 0x12d   : > { %v4411_v4 = vadd.f32 %v1148_v54, %v875_v20  ;;  %v1704_v54 = vld [vmem:[#allocation3 + $0x18] sm:$0x11] }
 0x12e   : > { %v877_v23 = vpop.f32.mrf.mxu0 }
 0x12f   : > { %v4413_v31 = vadd.f32 %v1150_v48, %v877_v23 }
 0x130   : > { %v879_v27 = vpop.f32.mrf.mxu0 }
 0x14c   : > { %v1457_v29 = vpop.f32.mrf.mxu0 }
 0x14d   : > { %v1496_v32 = vadd.f32 %v1457_v29, %v1117_v1  ;;  %v1143_v1 = vadd.f32 %v1142_v25, %v869_v14  ;;  %v1152_v29 = vpop.f32.mrf.mxu1 }
 0x14e   : > { %v1459_v34 = vpop.f32.mrf.mxu0  ;;  %v4416_v13 = vadd.f32 %v1152_v29, %v879_v27 }
 0x14f   : > { %v1524_v36 = vadd.f32 %v4400_v28, %v1496_v32  ;;  %v1497_v37 = vadd.f32 %v1459_v34, %v1119_v30 }
 0x150   : > { %v1461_v38 = vpop.f32.mrf.mxu0 }
 0x151   : > { %v1525_v40 = vadd.f32 %v4404_v33, %v1497_v37  ;;  %v1498_v41 = vadd.f32 %v1461_v38, %v1121_v35  ;;  %v1540_v44 = vmax.f32 %v1524_v36, 0.0 }
 0x152   : > { %v1463_v43 = vpop.f32.mrf.mxu0 }
 0x153   : > { %v1541_v45 = vmax.f32 %v1525_v40, 0.0  ;;  %v1526_v46 = vadd.f32 %v4400_v28, %v1498_v41  ;;  %v1499_v47 = vadd.f32 %v1463_v43, %v1123_v39 }
 0x154   : > { %v1467_v49 = vpop.f32.mrf.mxu0 }
 0x155   : > { %v3358_v50 = vpack.c.bf16 %v1541_v45, %v1540_v44  ;;  %v1527_v51 = vadd.f32 %v4404_v33, %v1499_v47  ;;  %v1500_v53 = vadd.f32 %v1467_v49, %v1127_v42  ;;  %v1542_v5 = vmax.f32 %v1526_v46, 0.0 }
 0x156   : > { %v1469_v63 = vpop.f32.mrf.mxu0 }
 0x157   : > { %v1621_v3 = vshrl.u32 %v3358_v50, 16  ;;  %v1543_v61 = vmax.f32 %v1527_v51, 0.0  ;;  %v1528_v62 = vadd.f32 %v4400_v28, %v1500_v53  ;;  %v1501_v30 = vadd.f32 %v1469_v63, %v1129_v56 }
 0x158   : > { %v1471_v32 = vpop.f32.mrf.mxu0  ;;  %v1624_v35 = vshll.u32 %v3358_v50, 16 }
 0x159   : > { %v1623_v34 = vrot.slane %v1621_v3, 7  ;;  %v3359_v36 = vpack.c.bf16 %v1543_v61, %v1542_v5  ;;  %v1502_v37 = vadd.f32 %v1471_v32, %v1131_v57  ;;  %v1529_v7 = vadd.f32 %v4404_v33, %v1501_v30 }
 0x15a   : > { %v1473_v10 = vpop.f32.mrf.mxu0  ;;  %v1544_v14 = vmax.f32 %v1528_v62, 0.0  ;;  %v1707_v62 = vld [vmem:[#allocation3] sm:$0xff] }
 0x15b   : > { %v1626_v8 = vor.u32 %v1624_v35, %v1623_v34  ;;  %v1629_v11 = vshrl.u32 %v3359_v36, 16  ;;  %v1627_v16 = vrot.slane %v1623_v34, 4  ;;  %v1545_v19 = vmax.f32 %v1529_v7, 0.0 }
 0x15c   : > { %v1530_v18 = vadd.f32 %v4400_v28, %v1502_v37  ;;  %v1503_v25 = vadd.f32 %v1473_v10, %v1133_v60  ;;  %v1477_v38 = vpop.f32.mrf.mxu0  ;;  %v1632_v23 = vshll.u32 %v3359_v36, 16 }
 0x15d   : > { %v1701_v15 = vsel %vm3917_vm2, %v1626_v8, %v1700_v6  ;;  %v1631_v20 = vrot.slane %v1629_v11, 7  ;;  %v1504_v21 = vadd.f32 %v1477_v38, %v1137_v58  ;;  %v3360_v39 = vpack.c.bf16 %v1545_v19, %v1544_v14 }
 0x15e   : > { %1702 = vst [vmem:[#allocation3 + $0x20] sm:$0xff] %v1701_v15  ;;  %v1546_v27 = vmax.f32 %v1530_v18, 0.0  ;;  %v1531_v40 = vadd.f32 %v4404_v33, %v1503_v25  ;;  %v1479_v41 = vpop.f32.mrf.mxu0  ;;  %v1789_v42 = vshrl.u32 %v1701_v15, 16  ;;  %v1792_v51 = vshll.u32 %v1701_v15, 16  ;;  %v1711_v18 = vld [vmem:[#allocation3 + $0x10] sm:$0x11] }
 0x15f   : > { %v1634_v43 = vor.u32 %v1632_v23, %v1631_v20  ;;  %v1636_v44 = vrot.slane %v1631_v20, 4  ;;  %v1532_v45 = vadd.f32 %v4400_v28, %v1504_v21  ;;  %v1505_v46 = vadd.f32 %v1479_v41, %v1139_v17 }
 0x160   : > { %v1638_v47 = vshrl.u32 %v3360_v39, 16  ;;  %v1641_v48 = vshll.u32 %v3360_v39, 16  ;;  %v1547_v49 = vmax.f32 %v1531_v40, 0.0  ;;  %v1481_v50 = vpop.f32.mrf.mxu0  ;;  %v1791_v32 = vrot.slane %v1789_v42, 4 }
 0x161   : > { %v4425_v53 = vsel %vm3900_vm15, %v1627_v16, %v1634_v43  ;;  %v1705_v56 = vsel %vm3873_vm8, %v1636_v44, %v1704_v54  ;;  %v1548_v57 = vmax.f32 %v1532_v45, 0.0  ;;  %v1533_v60 = vadd.f32 %v4404_v33, %v1505_v46  ;;  %v1714_v45 = vld [vmem:[#allocation3 + $0x38] sm:$0xff] }
 0x162   : > { %1706 = vst [vmem:[#allocation3 + $0x18] sm:$0x11] %v1705_v56  ;;  %v1640_v58 = vrot.slane %v1638_v47, 7  ;;  %v3361_v63 = vpack.c.bf16 %v1547_v49, %v1546_v27  ;;  %v1506_v3 = vadd.f32 %v1481_v50, %v1141_v26  ;;  %v1483_v5 = vpop.f32.mrf.mxu0  ;;  %v3231_v61 = vcombine.high %v1701_v15, %v4425_v53 }
 0x163   : > { %v1549_v17 = vmax.f32 %v1533_v60, 0.0  ;;  %v1507_v29 = vadd.f32 %v1483_v5, %v1143_v1  ;;  %v3230_v30 = vcombine.low %v1701_v15, %v4425_v53  ;;  %v1794_v16 = vrot.slane %v1792_v51, 5 }
 0x164   : > { %v1643_v34 = vor.u32 %v1641_v48, %v1640_v58  ;;  %v1644_v35 = vrot.slane %v1640_v58, 4  ;;  %v1646_v36 = vshrl.u32 %v3361_v63, 16  ;;  %v1649_v37 = vshll.u32 %v3361_v63, 16  ;;  %v1487_v6 = vpop.f32.mrf.mxu0  ;;  %2414 = vmatprep.mubr.bf16.mxu0 %v3231_v61 }
 0x165   : > { %v3362_v7 = vpack.c.bf16 %v1549_v17, %v1548_v57  ;;  %v1534_v10 = vadd.f32 %v4400_v28, %v1506_v3  ;;  %v1535_v26 = vadd.f32 %v4404_v33, %v1507_v29  ;;  %v1508_v8 = vadd.f32 %v1487_v6, %v1147_v0  ;;  %2415 = vmatmul.mubr.bf16.vlgmr.msra.gmra.mxu0 %v3230_v30 }
 0x166   : > { %v4436_v11 = vsel %vm3917_vm2, %v1643_v34, %v1707_v62  ;;  %v1648_v1 = vrot.slane %v1646_v36, 7  ;;  %v1489_v14 = vpop.f32.mrf.mxu0  ;;  %v1798_v19 = vshll.u32 %v4425_v53, 16  ;;  %v1795_v61 = vor.u32 %v1794_v16, %v1791_v32  ;;  %v1718_v62 = vld [vmem:[#allocation3 + $0x48] sm:$0x11] }
 0x167   : > { %1709 = vst [vmem:[#allocation3] sm:$0xff] %v4436_v11  ;;  %v1655_v25 = vshrl.u32 %v3362_v7, 16  ;;  %v1658_v38 = vshll.u32 %v3362_v7, 16  ;;  %v1550_v15 = vmax.f32 %v1534_v10, 0.0  ;;  %v1551_v20 = vmax.f32 %v1535_v26, 0.0 }
 0x168   : > { %v1651_v23 = vor.u32 %v1649_v37, %v1648_v1  ;;  %v1653_v21 = vrot.slane %v1648_v1, 4  ;;  %v1536_v0 = vadd.f32 %v4400_v28, %v1508_v8  ;;  %v1509_v54 = vadd.f32 %v1489_v14, %v4411_v4  ;;  %v1491_v39 = vpop.f32.mrf.mxu0 }
 0x169   : > { %v1657_v27 = vrot.slane %v1655_v25, 7  ;;  %v3363_v40 = vpack.c.bf16 %v1551_v20, %v1550_v15  ;;  %v1510_v41 = vadd.f32 %v1491_v39, %v4413_v31  ;;  %v1813_v42 = vshrl.u32 %v4436_v11, 16  ;;  %v4460_v5 = vld [vmem:[#allocation3 + $0x18] sm:$0x11] }
 0x16a   : > { %v4446_v43 = vsel %vm3900_vm15, %v1644_v35, %v1651_v23  ;;  %v1712_v44 = vsel %vm3873_vm8, %v1653_v21, %v1711_v18  ;;  %v1552_v46 = vmax.f32 %v1536_v0, 0.0  ;;  %v1537_v47 = vadd.f32 %v4404_v33, %v1509_v54  ;;  %v1493_v48 = vpop.f32.mrf.mxu0  ;;  %v1721_v18 = vld [vmem:[#allocation3 + $0x40] sm:$0xff] }
 0x16b   : > { %1713 = vst [vmem:[#allocation3 + $0x10] sm:$0x11] %v1712_v44  ;;  %v1660_v4 = vor.u32 %v1658_v38, %v1657_v27  ;;  %v1661_v49 = vrot.slane %v1657_v27, 4  ;;  %v1663_v50 = vshrl.u32 %v3363_v40, 16  ;;  %v1666_v51 = vshll.u32 %v3363_v40, 16 }
 0x16c   : > { %v1553_v31 = vmax.f32 %v1537_v47, 0.0  ;;  %v1538_v56 = vadd.f32 %v4400_v28, %v1510_v41  ;;  %v1511_v57 = vadd.f32 %v1493_v48, %v4416_v13  ;;  %v1816_v60 = vshll.u32 %v4436_v11, 16  ;;  %v1725_v48 = vld [vmem:[#allocation3 + $0x8] sm:$0x11] }
 0x16d   : > { %v4456_v58 = vsel %vm3917_vm2, %v1660_v4, %v1714_v45  ;;  %v1665_v63 = vrot.slane %v1663_v50, 7  ;;  %v3233_v3 = vcombine.high %v4436_v11, %v4446_v43  ;;  %v1800_v29 = vrot.slane %v1798_v19, 5 }
 0x16e   : > { %1716 = vst [vmem:[#allocation3 + $0x38] sm:$0xff] %v4456_v58  ;;  %v3364_v17 = vpack.c.bf16 %v1553_v31, %v1552_v46  ;;  %v1554_v28 = vmax.f32 %v1538_v56, 0.0  ;;  %v1539_v13 = vadd.f32 %v4404_v33, %v1511_v57  ;;  %v1796_v35 = vrot.slane %v1795_v61, 4  ;;  %v3614_v57 = vld [vmem:[%s4754_s3 + $0x270] ss:$8 sps:$4 sm:$0xff]  }
 0x16f   : > { %v1668_v30 = vor.u32 %v1666_v51, %v1665_v63  ;;  %v1670_v34 = vrot.slane %v1665_v63, 4  ;;  %2424 = vmatprep.mubr.bf16.mxu0 %v3233_v3  ;;  %v1802_v36 = vshrl.u32 %v4425_v53, 16  ;;  %v1808_v10 = vshll.u32 %v4460_v5, 16 }
 0x170   : > { %v1672_v37 = vshrl.u32 %v3364_v17, 16  ;;  %v1675_v6 = vshll.u32 %v3364_v17, 16  ;;  %v1555_v7 = vmax.f32 %v1539_v13, 0.0  ;;  %v1801_v33 = vsel %vm3975_vm5, %v1796_v35, %v1800_v29 }
 0x171   : > { %v4468_v32 = vsel %vm3900_vm15, %v1661_v49, %v1668_v30  ;;  %v1719_v26 = vsel %vm3873_vm8, %v1670_v34, %v1718_v62  ;;  %v1804_v8 = vrot.slane %v1802_v36, 4  ;;  %v1810_v16 = vrot.slane %v1808_v10, 5 }
 0x172   : > { %1720 = vst [vmem:[#allocation3 + $0x48] sm:$0x11] %v1719_v26  ;;  %v1674_v1 = vrot.slane %v1672_v37, 7  ;;  %v3365_v14 = vpack.c.bf16 %v1555_v7, %v1554_v28  ;;  %v3232_v19 = vcombine.low %v4436_v11, %v4446_v43  ;;  %v1837_v38 = vshrl.u32 %v4456_v58, 16  ;;  %v4480_v23 = vld [vmem:[#allocation3 + $0x10] sm:$0x11] }
 0x173   : > { %v1805_v25 = vor.u32 %v1804_v8, %v1800_v29  ;;  %v1840_v15 = vshll.u32 %v4456_v58, 16  ;;  %v3235_v20 = vcombine.high %v4456_v58, %v4468_v32  ;;  %v1815_v40 = vrot.slane %v1813_v42, 4  ;;  %v3622_v26 = vld [vmem:[%s4754_s3 + $0x254] ss:$8 sps:$4 sm:$0xff]  }
 0x174   : > { %v1677_v21 = vor.u32 %v1675_v6, %v1674_v1  ;;  %v1678_v0 = vrot.slane %v1674_v1, 4  ;;  %v1680_v54 = vshrl.u32 %v3365_v14, 16  ;;  %v1683_v39 = vshll.u32 %v3365_v14, 16  ;;  %2425 = vmatmul.mubr.bf16.gmra.mxu0 %v3232_v19 }
 0x175   : > { %v1806_v27 = vrot.slane %v1805_v25, 4  ;;  %2434 = vmatprep.mubr.bf16.mxu0 %v3235_v20  ;;  %v1818_v11 = vrot.slane %v1816_v60, 5  ;;  %v1822_v41 = vshll.u32 %v4446_v43, 16  ;;  %v1826_v46 = vshrl.u32 %v4446_v43, 16  ;;  %v3619_v60 = vld [vmem:[%s4754_s3 + $0x264] ss:$8 sps:$4 sm:$0xff]  }
 0x176   : > { %v4485_v44 = vsel %vm3917_vm2, %v1677_v21, %v1721_v18  ;;  %v1682_v45 = vrot.slane %v1680_v54, 7  ;;  %v1832_v47 = vshll.u32 %v4480_v23, 16  ;;  %v3234_v50 = vcombine.low %v4456_v58, %v4468_v32 }
 0x177   : > { %1723 = vst [vmem:[#allocation3 + $0x40] sm:$0xff] %v4485_v44  ;;  %v1811_v4 = vsel %vm3975_vm5, %v1806_v27, %v1810_v16  ;;  %v1819_v49 = vor.u32 %v1818_v11, %v1815_v40  ;;  %v1824_v42 = vrot.slane %v1822_v41, 5  ;;  %v1828_v3 = vrot.slane %v1826_v46, 4  ;;  %v3625_v40 = vld [vmem:[%s4754_s3 + $0x244] ss:$8 sps:$4 sm:$0xff]  }
 0x178   : > { %v1685_v51 = vor.u32 %v1683_v39, %v1682_v45  ;;  %v1687_v12 = vrot.slane %v1682_v45, 4  ;;  %v3190_v31 = vcombine.low %v1801_v33, %v1811_v4  ;;  %v3191_v56 = vcombine.high %v1801_v33, %v1811_v4 }
 0x179   : > { %v1820_v63 = vrot.slane %v1819_v49, 4  ;;  %v1834_v61 = vrot.slane %v1832_v47, 5  ;;  %v1861_v62 = vshrl.u32 %v4485_v44, 16  ;;  %v4501_v17 = vld [vmem:[#allocation3 + $0x48] sm:$0x11]  ;;  %v1864_v13 = vshll.u32 %v4485_v44, 16 }
 0x17a   : > { %v4505_v58 = vsel %vm3900_vm15, %v1678_v0, %v1685_v51  ;;  %v1726_v28 = vsel %vm3873_vm8, %v1687_v12, %v1725_v48  ;;  %2141 = vmatprep.mubr.bf16.mxu1 %v3191_v56  ;;  %v1839_v29 = vrot.slane %v1837_v38, 4  ;;  %v1829_v34 = vor.u32 %v1828_v3, %v1824_v42  ;;  %v3620_v0 = vld [vmem:[%s4754_s3 + $0x250] ss:$8 sps:$4 sm:$0xff]   ;;  %v3623_v48 = vld [vmem:[%s4754_s3 + $0x240] ss:$8 sps:$4 sm:$0xff]  }
 0x17b   : > { %1727 = vst [vmem:[#allocation3 + $0x8] sm:$0x11] %v1726_v28  ;;  %2142 = vmatmul.mubr.bf16.vlgmr.msra.gmra.mxu1 %v3190_v31  ;;  %v1825_v30 = vsel %vm3975_vm5, %v1820_v63, %v1824_v42  ;;  %v3237_v35 = vcombine.high %v4485_v44, %v4505_v58  ;;  %v1842_v36 = vrot.slane %v1840_v15, 5  ;;  %v1846_v2 = vshll.u32 %v4468_v32, 16  ;;  %v3626_v63 = vld [vmem:[%s4754_s3 + $0x230] ss:$8 sps:$4 sm:$0xff]  }
 0x17c   : > { %2721 = vmatpush1.bf16.msra.mxu1 %v3614_v57  ;;  %2435 = vmatmul.mubr.bf16.gmra.mxu0 %v3234_v50  ;;  %v1850_v37 = vshrl.u32 %v4468_v32, 16  ;;  %v1856_v6 = vshll.u32 %v4501_v17, 16  ;;  %v3236_v7 = vcombine.low %v4485_v44, %v4505_v58  ;;  %v1830_v10 = vrot.slane %v1829_v34, 4  ;;  %v3628_v50 = vld [vmem:[%s4754_s3 + $0x234] ss:$8 sps:$4 sm:$0xff]  }
 0x17d   : > { %2722 = vmatprep.subr.bf16.mxu1 %v3619_v60  ;;  %2444 = vmatprep.mubr.bf16.mxu0 %v3237_v35  ;;  %v1843_v33 = vor.u32 %v1842_v36, %v1839_v29  ;;  %v1863_v8 = vrot.slane %v1861_v62, 4  ;;  %v1866_v1 = vrot.slane %v1864_v13, 5  ;;  %v1848_v14 = vrot.slane %v1846_v2, 5  ;;  %v2455_v28 = vld [vmem:[#allocation3 + $0x20] sm:$0xee] }
 0x17e   : > { %v1852_v16 = vrot.slane %v1850_v37, 4  ;;  %v1858_v19 = vrot.slane %v1856_v6, 5  ;;  %v1870_v18 = vshll.u32 %v4505_v58, 16  ;;  %v1835_v25 = vsel %vm3975_vm5, %v1830_v10, %v1834_v61  ;;  %v2458_v60 = vld [vmem:[#allocation3 + $0x40] sm:$0xee] }
 0x17f   : > { %v1844_v38 = vrot.slane %v1843_v33, 4  ;;  %v1867_v15 = vor.u32 %v1866_v1, %v1863_v8  ;;  %v1874_v20 = vshrl.u32 %v4505_v58, 16  ;;  %v3193_v21 = vcombine.high %v1825_v30, %v1835_v25  ;;  %v3631_v61 = vld [vmem:[%s4754_s3 + $0x224] ss:$8 sps:$4 sm:$0xff]   ;;  %v3629_v34 = vld [vmem:[%s4754_s3 + $0x220] ss:$8 sps:$4 sm:$0xff]  }
 0x180   : > { %2723 = vmatpush1.bf16.msra.mxu1 %v3617_v52  ;;  %v3192_v54 = vcombine.low %v1825_v30, %v1835_v25  ;;  %v1853_v39 = vor.u32 %v1852_v16, %v1848_v14  ;;  %v1872_v27 = vrot.slane %v1870_v18, 5  ;;  %v2469_v62 = vrot.slane %v4425_v53, 5  ;;  %v3634_v53 = vld [vmem:[%s4754_s3 + $0x214] ss:$8 sps:$4 sm:$0xff]   ;;  %v3632_v10 = vld [vmem:[%s4754_s3 + $0x210] ss:$8 sps:$4 sm:$0xff]  }
 0x181   : > { %2724 = vmatprep.subr.bf16.mxu1 %v3622_v26  ;;  %v1876_v11 = vrot.slane %v1874_v20, 4  ;;  %2151 = vmatprep.mubr.bf16.mxu1 %v3193_v21  ;;  %v1868_v45 = vrot.slane %v1867_v15, 4  ;;  %v1849_v4 = vsel %vm3975_vm5, %v1844_v38, %v1848_v14  ;;  %v3273_v13 = vrot.slane %v2458_v60, 9  ;;  %v3637_v33 = vld [vmem:[%s4754_s3 + $0x204] ss:$8 sps:$4 sm:$0xff]  }
 0x182   : > { %v1854_v41 = vrot.slane %v1853_v39, 4  ;;  %v1787_v44 = vld [vmem:[#allocation3 + $0x8] sm:$0x11]  ;;  %v2490_v29 = vrot.slane %v4505_v58, 5  ;;  %v2472_v30 = vrot.slane %v4460_v5, 5  ;;  %v3270_v36 = vrot.slane %v2455_v28, 9 }
 0x183   : > { %2152 = vmatmul.mubr.bf16.gmra.mxu1 %v3192_v54  ;;  %v1877_v46 = vor.u32 %v1876_v11, %v1872_v27  ;;  %v1880_v47 = vshll.u32 %v1787_v44, 16  ;;  %v1873_v56 = vsel %vm3975_vm5, %v1868_v45, %v1872_v27  ;;  %v2493_v55 = vrot.slane %v1787_v44, 5  ;;  %v3635_v1 = vld [vmem:[%s4754_s3 + $0x200] ss:$8 sps:$4 sm:$0xff]   ;;  %v3640_v14 = vld [vmem:[%s4754_s3 + $0x2f4] ss:$8 sps:$4 sm:$0xff]  }
 0x184   : > { %2725 = vmatpush1.bf16.msra.mxu1 %v3620_v0  ;;  %v1859_v49 = vsel %vm3975_vm5, %v1854_v41, %v1858_v19  ;;  %2445 = vmatmul.mubr.bf16.gmra.mxu0 %v3236_v7  ;;  %v2492_v35 = vrot.slane %v2490_v29, 4  ;;  %v2471_v52 = vrot.slane %v2469_v62, 4  ;;  %v4566_v58 = vsel %vm4083_vm9, %v3273_v13, %v2490_v29  ;;  %v3638_v16 = vld [vmem:[%s4754_s3 + $0x2f0] ss:$8 sps:$4 sm:$0xff]   ;;  %v3643_v19 = vld [vmem:[%s4754_s3 + $0x2e4] ss:$8 sps:$4 sm:$0xff]  }
 0x185   : > { %2726 = vmatprep.subr.bf16.mxu1 %v3625_v40  ;;  %v3195_v42 = vcombine.high %v1849_v4, %v1859_v49  ;;  %v1878_v51 = vrot.slane %v1877_v46, 4  ;;  %v1882_v12 = vrot.slane %v1880_v47, 5  ;;  %v3194_v31 = vcombine.low %v1849_v4, %v1859_v49  ;;  %v3641_v18 = vld [vmem:[%s4754_s3 + $0x2e0] ss:$8 sps:$4 sm:$0xff]   ;;  %v3646_v25 = vld [vmem:[%s4754_s3 + $0x2d4] ss:$8 sps:$4 sm:$0xff]  }
 0x186   : > { %v4570_v5 = vsel %vm4083_vm9, %v2492_v35, %v2493_v55  ;;  %v2473_v37 = vsel %vm4083_vm9, %v2471_v52, %v2472_v30  ;;  %v2470_v26 = vsel %vm4083_vm9, %v3270_v36, %v2469_v62  ;;  %v3644_v38 = vld [vmem:[%s4754_s3 + $0x2d0] ss:$8 sps:$4 sm:$0xff]   ;;  %v3649_v15 = vld [vmem:[%s4754_s3 + $0x2c4] ss:$8 sps:$4 sm:$0xff]   ;;  %v3647_v20 = vld [vmem:[%s4754_s3 + $0x2c0] ss:$8 sps:$4 sm:$0xff]  }
 0x187   : > { %2161 = vmatprep.mubr.bf16.mxu1 %v3195_v42  ;;  %v1883_v57 = vsel %vm3975_vm5, %v1878_v51, %v1882_v12  ;;  %v3313_v6 = vcombine.high %v4566_v58, %v4570_v5  ;;  %v3312_v7 = vcombine.low %v4566_v58, %v4570_v5  ;;  %v3307_v8 = vcombine.high %v2470_v26, %v2473_v37  ;;  %v3652_v21 = vld [vmem:[%s4754_s3 + $0x2b4] ss:$8 sps:$4 sm:$0xff]   ;;  %v3650_v0 = vld [vmem:[%s4754_s3 + $0x2b0] ss:$8 sps:$4 sm:$0xff]   ;;  %v3655_v54 = vld [vmem:[%s4754_s3 + $0x2a4] ss:$8 sps:$4 sm:$0xff]  }
 0x188   : > { %2727 = vmatpush1.bf16.msra.mxu1 %v3623_v48  ;;  %v3197_v3 = vcombine.high %v1873_v56, %v1883_v57  ;;  %v3196_v2 = vcombine.low %v1873_v56, %v1883_v57  ;;  %v3653_v39 = vld [vmem:[%s4754_s3 + $0x2a0] ss:$8 sps:$4 sm:$0xff]   ;;  %v3658_v27 = vld [vmem:[%s4754_s3 + $0x294] ss:$8 sps:$4 sm:$0xff]   ;;  %v3656_v40 = vld [vmem:[%s4754_s3 + $0x290] ss:$8 sps:$4 sm:$0xff]   ;;  %v3306_v49 = vcombine.low %v2470_v26, %v2473_v37 }
 0x189   : > { %2728 = vmatprep.subr.bf16.mxu1 %v3628_v50  ;;  %v3661_v11 = vld [vmem:[%s4754_s3 + $0x284] ss:$8 sps:$4 sm:$0xff]   ;;  %v2476_v41 = vrot.slane %v4446_v43, 5  ;;  %v2479_v45 = vrot.slane %v4480_v23, 5  ;;  %v3659_v46 = vld [vmem:[%s4754_s3 + $0x280] ss:$8 sps:$4 sm:$0xff]  }
 0x18a   : > { %v2456_v44 = vld [vmem:[#allocation3] sm:$0xee]  ;;  %v2483_v43 = vrot.slane %v4468_v32, 5  ;;  %v2457_v23 = vld [vmem:[#allocation3 + $0x38] sm:$0xee]  ;;  %v2486_v51 = vrot.slane %v4501_v17, 5 }
 0x18b   : > { %2162 = vmatmul.mubr.bf16.gmra.mxu1 %v3194_v31  ;;  %v3271_v47 = vrot.slane %v2456_v44, 9  ;;  %v2478_v48 = vrot.slane %v2476_v41, 4  ;;  %v3272_v12 = vrot.slane %v2457_v23, 9 }
 0x18c   : > { %2729 = vmatpush1.bf16.msra.mxu1 %v3626_v63  ;;  %2171 = vmatprep.mubr.bf16.mxu1 %v3197_v3  ;;  %v2485_v31 = vrot.slane %v2483_v43, 4 }
 0x18d   : > { %2730 = vmatprep.subr.bf16.mxu1 %v3631_v61  ;;  %v2480_v4 = vsel %vm4083_vm9, %v2478_v48, %v2479_v45  ;;  %v2477_v42 = vsel %vm4083_vm9, %v3271_v47, %v2476_v41  ;;  %v2484_v60 = vsel %vm4083_vm9, %v3272_v12, %v2483_v43  ;;  %v1731_v43 = vld [vmem:[%s3862_s27 + $0x18] sm:$0xff] }
 0x18e   : > { %v3309_v50 = vcombine.high %v2477_v42, %v2480_v4  ;;  %v2487_v56 = vsel %vm4083_vm9, %v2485_v31, %v2486_v51  ;;  %v3308_v57 = vcombine.low %v2477_v42, %v2480_v4 }
 0x18f   : > { %v3311_v63 = vcombine.high %v2484_v60, %v2487_v56  ;;  %v3310_v3 = vcombine.low %v2484_v60, %v2487_v56 }
 0x190   : > { %2731 = vmatpush1.bf16.msra.mxu1 %v3629_v34 }
 0x191   : > { %2732 = vmatprep.subr.bf16.mxu1 %v3634_v53 }
 0x193   : > { %2172 = vmatmul.mubr.bf16.gmra.mxu1 %v3196_v2 }
 0x194   : > { %2733 = vmatpush1.bf16.msra.mxu1 %v3632_v10  ;;  %2752 = vmatprep.mubr.bf16.mxu1 %v3307_v8 }
 0x195   : > { %2734 = vmatprep.subr.bf16.mxu1 %v3637_v33  ;;  %v2809_v33 = vld [vmem:[%s4755_s4] sm:$0x3] }
 0x198   : > { %2735 = vmatpush1.bf16.msra.mxu1 %v3635_v1 }
 0x199   : > { %2736 = vmatprep.subr.bf16.mxu1 %v3640_v14 }
 0x19c   : > { %2737 = vmatpush2.bf16.msra.mxu1 %v3638_v16  ;;  %v4678_v16 = vrot.slane %v2809_v33, %v1516_v24 }
 0x19d   : > { %2738 = vmatprep.subr.bf16.mxu1 %v3643_v19 }
 0x1a0   : > { %2739 = vmatpush2.bf16.msra.mxu1 %v3641_v18 }
 0x1a1   : > { %2740 = vmatprep.subr.bf16.mxu1 %v3646_v25 }
 0x1a4   : > { %2741 = vmatpush2.bf16.msra.mxu1 %v3644_v38  ;;  %v4682_v38 = vrot.slane %v2809_v33, %v1520_v59 }
 0x1a5   : > { %2742 = vmatprep.subr.bf16.mxu1 %v3649_v15  ;;  %v1728_v15 = vld [vmem:[%s3862_s27] sm:$0xff] }
 0x1a8   : > { %2743 = vmatpush2.bf16.msra.mxu1 %v3647_v20 }
 0x1a9   : > { %2744 = vmatprep.subr.bf16.mxu1 %v3652_v21 }
 0x1ac   : > { %2745 = vmatpush2.bf16.msra.mxu1 %v3650_v0 }
 0x1ad   : > { %2746 = vmatprep.subr.bf16.mxu1 %v3655_v54 }
 0x1b0   : > { %2747 = vmatpush2.bf16.msra.mxu1 %v3653_v39 }
 0x1b1   : > { %2748 = vmatprep.subr.bf16.mxu1 %v3658_v27  ;;  %v1729_v27 = vld [vmem:[%s3862_s27 + $0x8] sm:$0xff] }
 0x1b4   : > { %2749 = vmatpush2.bf16.msra.mxu1 %v3656_v40 }
 0x1b5   : > { %2750 = vmatprep.subr.bf16.mxu1 %v3661_v11 }
 0x1b8   : > { %2751 = vmatpush2.bf16.msra.mxu1 %v3659_v46 }
 0x1bb   : > { %2753 = vmatmul.mubr.bf16.vlgmr.msra.gmra.mxu1 %v3306_v49 }
 0x1bc   : > { %2762 = vmatprep.mubr.bf16.mxu1 %v3309_v50 }
 0x1c3   : > { %2763 = vmatmul.mubr.bf16.gmra.mxu1 %v3308_v57  ;;  %v1732_v57 = vld [vmem:[%s3862_s27 + $0x20] sm:$0xff] }
 0x1c4   : > { %2772 = vmatprep.mubr.bf16.mxu1 %v3311_v63 }
 0x1cb   : > { %2773 = vmatmul.mubr.bf16.gmra.mxu1 %v3310_v3 }
 0x1cc   : > { %2782 = vmatprep.mubr.bf16.mxu1 %v3313_v6 }
 0x1d3   : > { %2783 = vmatmul.mubr.bf16.gmra.mxu1 %v3312_v7 }
 0x225   : > { %v2416_v55 = vpop.f32.mrf.mxu0 }
 0x227   : > { %v2418_v34 = vpop.f32.mrf.mxu0 }
 0x229   : > { %v2420_v53 = vpop.f32.mrf.mxu0 }
 0x22b   : > { %v2422_v52 = vpop.f32.mrf.mxu0 }
 0x234   : > { %v2426_v5 = vpop.f32.mrf.mxu0 }
 0x236   : > { %v2428_v37 = vpop.f32.mrf.mxu0 }
 0x238   : > { %v2430_v7 = vpop.f32.mrf.mxu0 }
 0x23a   : > { %v2432_v26 = vpop.f32.mrf.mxu0 }
 0x23b   : > { %v2143_v32 = vpop.f32.mrf.mxu1 }
 0x23c   : > { %v2417_v1 = vadd.f32 %v2416_v55, %v2143_v32  ;;  %v2436_v14 = vpop.f32.mrf.mxu0 }
 0x23d   : > { %v2145_v17 = vpop.f32.mrf.mxu1 }
 0x23e   : > { %v2419_v18 = vadd.f32 %v2418_v34, %v2145_v17  ;;  %v2438_v0 = vpop.f32.mrf.mxu0 }
 0x23f   : > { %v2147_v61 = vpop.f32.mrf.mxu1 }
 0x240   : > { %v2421_v21 = vadd.f32 %v2420_v53, %v2147_v61  ;;  %v2440_v46 = vpop.f32.mrf.mxu0 }
 0x241   : > { %v2149_v62 = vpop.f32.mrf.mxu1 }
 0x242   : > { %v2423_v40 = vadd.f32 %v2422_v52, %v2149_v62  ;;  %v2442_v63 = vpop.f32.mrf.mxu0 }
 0x243   : > { %v2153_v28 = vpop.f32.mrf.mxu1 }
 0x244   : > { %v2427_v45 = vadd.f32 %v2426_v5, %v2153_v28  ;;  %v1733_v28 = vld [vmem:[%s3862_s27 + $0x28] sm:$0xff]  ;;  %v1734_v5 = vld [vmem:[%s3862_s27 + $0x30] sm:$0xff] }
 0x245   : > { %v2155_v9 = vpop.f32.mrf.mxu1 }
 0x246   : > { %v2429_v42 = vadd.f32 %v2428_v37, %v2155_v9 }
 0x247   : > { %v2157_v13 = vpop.f32.mrf.mxu1 }
 0x248   : > { %v2431_v56 = vadd.f32 %v2430_v7, %v2157_v13  ;;  %v2446_v7 = vpop.f32.mrf.mxu0 }
 0x249   : > { %v4655_v29 = vpop.f32.mrf.mxu1 }
 0x24a   : > { %v2433_v62 = vadd.f32 %v2432_v26, %v4655_v29 }
 0x24b   : > { %v4657_v30 = vpop.f32.mrf.mxu1 }
 0x24c   : > { %v2437_v52 = vadd.f32 %v2436_v14, %v4657_v30 }
 0x24d   : > { %v4659_v35 = vpop.f32.mrf.mxu1 }
 0x24f   : > { %v4661_v36 = vpop.f32.mrf.mxu1 }
 0x251   : > { %v4663_v58 = vpop.f32.mrf.mxu1 }
 0x253   : > { %v4665_v2 = vpop.f32.mrf.mxu1 }
 0x255   : > { %v4667_v6 = vpop.f32.mrf.mxu1 }
 0x257   : > { %v4669_v10 = vpop.f32.mrf.mxu1 }
 0x259   : > { %v4674_v8 = vpop.f32.mrf.mxu1 }
 0x27b   : > { %v2754_v19 = vpop.f32.mrf.mxu1 }
 0x27c   : > { %v2793_v25 = vadd.f32 %v2754_v19, %v2417_v1  ;;  %v2439_v19 = vadd.f32 %v2438_v0, %v4659_v35 }
 0x27d   : > { %v2756_v20 = vpop.f32.mrf.mxu1 }
 0x27e   : > { %v2821_v54 = vadd.f32 %v4678_v16, %v2793_v25  ;;  %v2794_v39 = vadd.f32 %v2756_v20, %v2419_v18  ;;  %v1735_v18 = vld [vmem:[%s3862_s27 + $0x38] sm:$0xff] }
 0x27f   : > { %v2758_v24 = vpop.f32.mrf.mxu1 }
 0x280   : > { %v2837_v11 = vadd.f32 %v2821_v54, %v1728_v15  ;;  %v2822_v41 = vadd.f32 %v4682_v38, %v2794_v39  ;;  %v2795_v44 = vadd.f32 %v2758_v24, %v2421_v21  ;;  %v2441_v21 = vadd.f32 %v2440_v46, %v4661_v36  ;;  %v1736_v54 = vld [vmem:[%s3862_s27 + $0x40] sm:$0xff] }
 0x281   : > { %v2760_v59 = vpop.f32.mrf.mxu1  ;;  %v2447_v46 = vadd.f32 %v2446_v7, %v4665_v2 }
 0x282   : > { %v2853_v47 = vmax.f32 %v2837_v11, 0.0  ;;  %v2838_v48 = vadd.f32 %v2822_v41, %v1729_v27  ;;  %v2823_v4 = vadd.f32 %v4678_v16, %v2795_v44  ;;  %v2796_v49 = vadd.f32 %v2760_v59, %v2423_v40  ;;  %v2448_v27 = vpop.f32.mrf.mxu0  ;;  %v1737_v41 = vld [vmem:[%s3862_s27 + $0x48] sm:$0xff] }
 0x283   : > { %v2764_v50 = vpop.f32.mrf.mxu1  ;;  %v2443_v11 = vadd.f32 %v2442_v63, %v4663_v58 }
 0x284   : > { %2869 = vst [vmem:[%s4693_s28] sm:$0xff] %v2853_v47  ;;  %v2854_v23 = vmax.f32 %v2838_v48, 0.0  ;;  %v2839_v51 = vadd.f32 %v2823_v4, %v1730_v22  ;;  %v2824_v12 = vadd.f32 %v4682_v38, %v2796_v49  ;;  %v2797_v31 = vadd.f32 %v2764_v50, %v2427_v45  ;;  %v1738_v47 = vld [vmem:[%s3862_s27 + $0x50] sm:$0xff]  ;;  %v2450_v4 = vpop.f32.mrf.mxu0 }
 0x285   : > { %v2766_v60 = vpop.f32.mrf.mxu1  ;;  %v2449_v50 = vadd.f32 %v2448_v27, %v4667_v6 }
 0x286   : > { %2870 = vst [vmem:[%s4693_s28 + $0x8] sm:$0xff] %v2854_v23  ;;  %v2855_v3 = vmax.f32 %v2839_v51, 0.0  ;;  %v2840_v32 = vadd.f32 %v2824_v12, %v1731_v43  ;;  %v2825_v17 = vadd.f32 %v4678_v16, %v2797_v31  ;;  %v2798_v61 = vadd.f32 %v2766_v60, %v2429_v42  ;;  %v1739_v23 = vld [vmem:[%s3862_s27 + $0x58] sm:$0xff]  ;;  %v1740_v60 = vld [vmem:[%s3862_s27 + $0x60] sm:$0xff] }
 0x287   : > { %v2768_v9 = vpop.f32.mrf.mxu1 }
 0x288   : > { %2871 = vst [vmem:[%s4693_s28 + $0x10] sm:$0xff] %v2855_v3  ;;  %v2856_v55 = vmax.f32 %v2840_v32, 0.0  ;;  %v2841_v13 = vadd.f32 %v2825_v17, %v1732_v57  ;;  %v2826_v34 = vadd.f32 %v4682_v38, %v2798_v61  ;;  %v2799_v53 = vadd.f32 %v2768_v9, %v2431_v56  ;;  %v2452_v3 = vpop.f32.mrf.mxu0 }
 0x289   : > { %v2770_v37 = vpop.f32.mrf.mxu1  ;;  %v2451_v57 = vadd.f32 %v2450_v4, %v4669_v10 }
 0x28a   : > { %2872 = vst [vmem:[%s4693_s28 + $0x18] sm:$0xff] %v2856_v55  ;;  %v2857_v33 = vmax.f32 %v2841_v13, 0.0  ;;  %v2842_v29 = vadd.f32 %v2826_v34, %v1733_v28  ;;  %v2827_v26 = vadd.f32 %v4678_v16, %v2799_v53  ;;  %v2800_v1 = vadd.f32 %v2770_v37, %v2433_v62  ;;  %v1741_v28 = vld [vmem:[%s3862_s27 + $0x68] sm:$0xff]  ;;  %v1742_v53 = vld [vmem:[%s3862_s27 + $0x70] sm:$0xff] }
 0x28b   : > { %v2774_v25 = vpop.f32.mrf.mxu1  ;;  %v2453_v62 = vadd.f32 %v2452_v3, %v4674_v8 }
 0x28c   : > { %2873 = vst [vmem:[%s4693_s28 + $0x20] sm:$0xff] %v2857_v33  ;;  %v2858_v15 = vmax.f32 %v2842_v29, 0.0  ;;  %v2843_v30 = vadd.f32 %v2827_v26, %v1734_v5  ;;  %v2828_v14 = vadd.f32 %v4682_v38, %v2800_v1  ;;  %v2801_v20 = vadd.f32 %v2774_v25, %v2437_v52  ;;  %v1743_v33 = vld [vmem:[%s3862_s27 + $0x78] sm:$0xff] }
 0x28d   : > { %v2776_v39 = vpop.f32.mrf.mxu1 }
 0x28e   : > { %2874 = vst [vmem:[%s4693_s28 + $0x28] sm:$0xff] %v2858_v15  ;;  %v2859_v24 = vmax.f32 %v2843_v30, 0.0  ;;  %v2844_v35 = vadd.f32 %v2828_v14, %v1735_v18  ;;  %v2829_v0 = vadd.f32 %v4678_v16, %v2801_v20  ;;  %v2802_v40 = vadd.f32 %v2776_v39, %v2439_v19 }
 0x28f   : > { %v2778_v44 = vpop.f32.mrf.mxu1 }
 0x290   : > { %2875 = vst [vmem:[%s4693_s28 + $0x30] sm:$0xff] %v2859_v24  ;;  %v2860_v45 = vmax.f32 %v2844_v35, 0.0  ;;  %v2845_v36 = vadd.f32 %v2829_v0, %v1736_v54  ;;  %v2830_v22 = vadd.f32 %v4682_v38, %v2802_v40  ;;  %v2803_v59 = vadd.f32 %v2778_v44, %v2441_v21 }
 0x291   : > { %v2780_v48 = vpop.f32.mrf.mxu1 }
 0x292   : > { %2876 = vst [vmem:[%s4693_s28 + $0x38] sm:$0xff] %v2860_v45  ;;  %v2861_v49 = vmax.f32 %v2845_v36, 0.0  ;;  %v2846_v58 = vadd.f32 %v2830_v22, %v1737_v41  ;;  %v2831_v42 = vadd.f32 %v4678_v16, %v2803_v59  ;;  %v2804_v43 = vadd.f32 %v2780_v48, %v2443_v11 }
 0x293   : > { %v2784_v51 = vpop.f32.mrf.mxu1 }
 0x294   : > { %2877 = vst [vmem:[%s4693_s28 + $0x40] sm:$0xff] %v2861_v49  ;;  %v2862_v12 = vmax.f32 %v2846_v58, 0.0  ;;  %v2847_v2 = vadd.f32 %v2831_v42, %v1738_v47  ;;  %v2832_v31 = vadd.f32 %v4682_v38, %v2804_v43  ;;  %v2805_v56 = vadd.f32 %v2784_v51, %v2447_v46 }
 0x295   : > { %v2786_v63 = vpop.f32.mrf.mxu1 }
 0x296   : > { %2878 = vst [vmem:[%s4693_s28 + $0x48] sm:$0xff] %v2862_v12  ;;  %v2863_v32 = vmax.f32 %v2847_v2, 0.0  ;;  %v2848_v6 = vadd.f32 %v2832_v31, %v1739_v23  ;;  %v2833_v17 = vadd.f32 %v4678_v16, %v2805_v56  ;;  %v2806_v61 = vadd.f32 %v2786_v63, %v2449_v50 }
 0x297   : > { %v2788_v9 = vpop.f32.mrf.mxu1 }
 0x298   : > { %2879 = vst [vmem:[%s4693_s28 + $0x50] sm:$0xff] %v2863_v32  ;;  %v2864_v55 = vmax.f32 %v2848_v6, 0.0  ;;  %v2849_v10 = vadd.f32 %v2833_v17, %v1740_v60  ;;  %v2834_v13 = vadd.f32 %v4682_v38, %v2806_v61  ;;  %v2807_v34 = vadd.f32 %v2788_v9, %v2451_v57 }
 0x299   : > { %v2790_v52 = vpop.f32.mrf.mxu1 }
 0x29a   : > { %2880 = vst [vmem:[%s4693_s28 + $0x58] sm:$0xff] %v2864_v55  ;;  %v2865_v5 = vmax.f32 %v2849_v10, 0.0  ;;  %v2850_v37 = vadd.f32 %v2834_v13, %v1741_v28  ;;  %v2835_v7 = vadd.f32 %v4678_v16, %v2807_v34  ;;  %v2808_v8 = vadd.f32 %v2790_v52, %v2453_v62 }
 0x29c   : > { %2881 = vst [vmem:[%s4693_s28 + $0x60] sm:$0xff] %v2865_v5  ;;  %v2866_v29 = vmax.f32 %v2850_v37, 0.0  ;;  %v2851_v26 = vadd.f32 %v2835_v7, %v1742_v53  ;;  %v2836_v1 = vadd.f32 %v4682_v38, %v2808_v8 }
 0x29e   : > { %2882 = vst [vmem:[%s4693_s28 + $0x68] sm:$0xff] %v2866_v29  ;;  %v2867_v19 = vmax.f32 %v2851_v26, 0.0  ;;  %v2852_v18 = vadd.f32 %v2836_v1, %v1743_v33 }
 0x2a0   : > { %2883 = vst [vmem:[%s4693_s28 + $0x70] sm:$0xff] %v2867_v19  ;;  %v2868_v25 = vmax.f32 %v2852_v18, 0.0 }
 0x2a2   : > { %2884 = vst [vmem:[%s4693_s28 + $0x78] sm:$0xff] %v2868_v25 }
 0x2a3 PF: > { %s15_s18 = sadd.s32 1, %s3668_s18  }
 0x2a4   : > { %p12_p4 = scmp.ge.s32.totalorder %s15_s18, 4  }
 0x2a6   :  { %14 = sbr.rel (!%p12_p4) target bundleno = 1 (0x1), region = 74 }

</bundles_post_ra>
